<compile_context>
chip_gen: v7x
topology: tpu7x:2x2x1
jax: 0.10.0
libtpu: 0.0.40
codegen_flags: <defaults>
</compile_context>

<pallas_src>
import numpy as np
import jax
import jax.numpy as jnp
from jax.experimental import pallas as pl
from jax.experimental.pallas import tpu as pltpu

NEG_SLOPE = 0.2
EPS = 1e-6

# Conservative budget for the folded-weight trick (leaves double-buffer + activation
# headroom inside a 32 MiB scoped-VMEM limit on every generation incl. v7x).
_FOLDED_WEIGHT_BUDGET_BYTES = 16 * 1024 * 1024


def _leaky_relu(x):
    # max(x, 0.2*x) == leaky_relu(x, 0.2) exactly; one vmul+vmax per vreg.
    return jnp.maximum(x, NEG_SLOPE * x)


def _round_up(x, m):
    return ((x + m - 1) // m) * m


# ----------------------------- fused Pallas kernel ---------------------------

def _make_encoder_kernel(n_layers):
    """Fused encoder kernel body (one batch tile per grid step).

    Ref layout:
      inputs : x, w0, b0, [w_i, b_i, pavg_i] * (n_layers-1), mpool
      outputs: enc_0, [enc_{2i-1}, enc_{2i}] * (n_layers-1), pooled
    Activations are (BM, C*H*W) CHW-flattened f32 (lane-dense last dims).
    Conv weights are bf16; biases f32; pavg/mpool bf16 (entries are exact powers
    of two) but upcast so the InstanceNorm statistics are computed in f32.
    """
    n_in = 3 * n_layers + 1

    def kernel(*refs):
        in_refs, out_refs = refs[:n_in], refs[n_in:]

        # conv0 (folded) + bias + leaky_relu.  bf16 x bf16 operands, f32 acc.
        h = in_refs[0][...]                                    # (BM, Cin*H*W) f32
        h = _leaky_relu(
            jnp.dot(h.astype(jnp.bfloat16), in_refs[1][...],
                    preferred_element_type=jnp.float32)
            + in_refs[2][...])
        out_refs[0][...] = h                                   # encoder_0

        ri, oi = 3, 1
        for _ in range(1, n_layers):
            w = in_refs[ri][...]                               # bf16 folded conv
            b = in_refs[ri + 1][...]                           # f32 (1, N)
            pavg = in_refs[ri + 2][...].astype(jnp.float32)    # kron(I_C, 1/P)
            ri += 3

            # conv + bias + leaky_relu
            h = _leaky_relu(
                jnp.dot(h.astype(jnp.bfloat16), w,
                        preferred_element_type=jnp.float32) + b)
            out_refs[oi][...] = h                              # encoder_{2i-1}
            oi += 1

            # InstanceNorm2d(affine=False, eps=1e-6) + leaky_relu, fused here.
            # Both stat matmuls depend only on h (var = E[h^2] - mean^2), so the
            # MXU pushes issue back-to-back instead of mean -> sub/square -> var.
            # Stats stay in f32: tiny spatial groups (P as small as 4) amplify
            # operand-rounding error through 1/std.
            mean = jnp.dot(h, pavg, preferred_element_type=jnp.float32)
            msq = jnp.dot(h * h, pavg, preferred_element_type=jnp.float32)
            var = jnp.maximum(msq - mean * mean, 0.0)          # guard cancellation
            h = _leaky_relu((h - mean) * jax.lax.rsqrt(var + EPS))
            out_refs[oi][...] = h                              # encoder_{2i}
            oi += 1

        # global average pool -> (BM, C_last)
        mpool = in_refs[ri][...].astype(jnp.float32)
        out_refs[oi][...] = jnp.dot(h, mpool,
                                    preferred_element_type=jnp.float32)

    return kernel


# --------------------------- parameter preparation ---------------------------

def _conv_dense_matrix(w_hwio, hin, win, k=4, s=2, pad=1):
    """Fold a (kh,kw,Cin,Cout) conv into a dense (Cin*Hin*Win, Cout*Ho*Wo)
    matrix acting on CHW-flattened activations (im2col folded into weights)."""
    kh, kw, cin, cout = w_hwio.shape
    hout = (hin + 2 * pad - k) // s + 1
    wout = (win + 2 * pad - k) // s + 1
    w_np = np.asarray(w_hwio, np.float32)
    weff = np.zeros((cin, hin, win, cout, hout, wout), np.float32)
    for oh in range(hout):
        for ow in range(wout):
            for ky in range(kh):
                for kx in range(kw):
                    ih = s * oh - pad + ky
                    iw = s * ow - pad + kx
                    if 0 <= ih < hin and 0 <= iw < win:
                        weff[:, ih, iw, :, oh, ow] = w_np[ky, kx]
    return weff.reshape(cin * hin * win, cout * hout * wout), (cout, hout, wout)


def prepare_encoder(params, in_shape):
    """One-time weight preprocessing for the fused kernel.

    Returns (tensors, meta):
      tensors: flat list of jnp arrays in kernel-argument order
               (conv matrices / pooling matrices in bf16, biases in f32)
      meta   : python (C, H, W) per recorded activation (for output reshapes)
    """
    _, h, w = in_shape
    tensors, meta = [], []
    cout, p = None, None

    def add_conv(wb):
        nonlocal h, w
        weff, (co, ho, wo) = _conv_dense_matrix(wb[0], h, w)
        beff = np.repeat(np.asarray(wb[1], np.float32), ho * wo)
        tensors.append(jnp.asarray(weff, dtype=jnp.bfloat16))   # bf16: halves DMA
        tensors.append(jnp.asarray(beff, dtype=jnp.float32)[None, :])
        h, w = ho, wo
        meta.append((co, ho, wo))
        return co, ho * wo

    cout, p = add_conv(params["conv0"])
    for wb in params["layers"]:
        cout, p = add_conv(wb)
        meta.append((cout, h, w))          # IN output: same shape as its conv
        pavg = np.kron(np.eye(cout, dtype=np.float32),
                       np.full((p, p), 1.0 / p, np.float32))
        tensors.append(jnp.asarray(pavg, dtype=jnp.bfloat16))   # 1/P exact in bf16
    mpool = np.kron(np.eye(cout, dtype=np.float32),
                    np.full((p, 1), 1.0 / p, np.float32))
    tensors.append(jnp.asarray(mpool, dtype=jnp.bfloat16))

    folded_bytes = int(sum(int(t.size) * t.dtype.itemsize for t in tensors))
    if folded_bytes > _FOLDED_WEIGHT_BUDGET_BYTES:
        # TODO(synk): switch to implicit-GEMM conv tiling (M=B*Ho*Wo, K=k*k*Cin)
        # before this trips; the dense folded-weight trick does not scale.
        raise NotImplementedError(
            "folded encoder weights (%d bytes) exceed the VMEM-resident budget; "
            "implicit-GEMM tiling required for this frame size" % folded_bytes)
    return tensors, tuple(meta)


def make_encoder_forward(params, in_shape):
    """Builds the jittable forward(x_nchw, tensors) closure."""
    tensors, meta = prepare_encoder(params, in_shape)
    n_layers = len(params["layers"]) + 1
    kernel = _make_encoder_kernel(n_layers)
    k_in = in_shape[0] * in_shape[1] * in_shape[2]
    out_dims = [c * hh * ww for (c, hh, ww) in meta] + [meta[-1][0]]

    def forward(x_nchw, tensors):
        b = x_nchw.shape[0]
        # Batch tile: at least 8 rows (f32 sublane min), up to 128 (MXU M-dim).
        # Callers with a time axis should fold frames into batch before calling.
        bm = min(128, _round_up(max(b, 1), 8))
        b_pad = _round_up(b, bm)

        # NCHW -> (B, C*H*W): pure metadata reshape, no transpose needed.
        x_flat = x_nchw.reshape(b, -1).astype(jnp.float32)
        if b_pad != b:
            x_flat = jnp.pad(x_flat, ((0, b_pad - b), (0, 0)))

        in_specs = [pl.BlockSpec((bm, k_in), lambda i: (i, 0))]
        for t in tensors:
            # Constant block index: weights are DMA'd once and stay resident
            # across all batch tiles.
            in_specs.append(pl.BlockSpec(t.shape, lambda i: (0, 0)))

        out_shape = tuple(jax.ShapeDtypeStruct((b_pad, n), jnp.float32)
                          for n in out_dims)
        out_specs = tuple(pl.BlockSpec((bm, n), lambda i: (i, 0))
                          for n in out_dims)

        outs = pl.pallas_call(
            kernel,
            grid=(b_pad // bm,),
            in_specs=in_specs,
            out_specs=out_specs,
            out_shape=out_shape,
            compiler_params=pltpu.CompilerParams(
                # Batch tiles are independent -> megacore-parallel on v7x.
                dimension_semantics=("parallel",),
                vmem_limit_bytes=32 * 1024 * 1024),
        )(x_flat, *tensors)

        results = {}
        for idx, (c, hh, ww) in enumerate(meta):
            # CHW flattening -> NCHW dict outputs via metadata-only reshape.
            results["encoder_%d" % idx] = outs[idx][:b].reshape(b, c, hh, ww)
        results["output"] = outs[-1][:b]
        return results

    return forward, tensors


# ------------------------------ parameter setup ------------------------------

def init_params(key, in_ch, nef=8, n_layers=3):
    """Deterministic synthetic init. Conv weights stored in HWIO layout."""
    keys = jax.random.split(key, 2 * n_layers)

    def conv_init(kw, kb, cin, cout):
        fan_in = cin * 4 * 4
        w = jax.random.normal(kw, (4, 4, cin, cout), jnp.float32) / np.sqrt(fan_in)
        b = 0.01 * jax.random.normal(kb, (cout,), jnp.float32)
        return w, b

    params = {"conv0": conv_init(keys[0], keys[1], in_ch, nef), "layers": []}
    c = nef
    for i in range(1, n_layers):
        cout = nef * min(2 ** i, 4)
        params["layers"].append(conv_init(keys[2 * i], keys[2 * i + 1], c, cout))
        c = cout
    return params


# --------------------------- pure-JAX reference check -------------------------

def reference_forward(x_nchw, params):
    def conv(x, w_hwio, b):
        y = jax.lax.conv_general_dilated(
            x, w_hwio, window_strides=(2, 2), padding=((1, 1), (1, 1)),
            dimension_numbers=("NCHW", "HWIO", "NCHW"),
            precision=jax.lax.Precision.HIGHEST)
        return y + b[None, :, None, None]

    def inorm(x):
        m = jnp.mean(x, axis=(2, 3), keepdims=True)
        v = jnp.mean((x - m) ** 2, axis=(2, 3), keepdims=True)
        return (x - m) * jax.lax.rsqrt(v + EPS)

    outs = {}
    o = _leaky_relu(conv(x_nchw, *params["conv0"]))
    outs["encoder_0"] = o
    n = 0
    for (w, b) in params["layers"]:
        n += 1
        o = _leaky_relu(conv(o, w, b))
        outs["encoder_%d" % n] = o
        n += 1
        o = _leaky_relu(inorm(o))
        outs["encoder_%d" % n] = o
    outs["output"] = jnp.mean(o, axis=(2, 3))
    return outs


# ------------------------------------ main ------------------------------------

if __name__ == "__main__":
    key = jax.random.PRNGKey(0)
    kx, kp = jax.random.split(key)

    # small shapes consistent with the module: NCHW input, nef=8, n_layers=3
    x = jax.random.normal(kx, (2, 4, 16, 16), jnp.float32)
    params = init_params(kp, in_ch=4, nef=8, n_layers=3)

    forward, tensors = make_encoder_forward(params, in_shape=(4, 16, 16))
    fwd = jax.jit(forward)
    outs = fwd(x, tensors)
    outs = jax.tree_util.tree_map(jax.block_until_ready, outs)

    assert outs["encoder_0"].shape == (2, 8, 8, 8)
    assert outs["encoder_1"].shape == (2, 16, 4, 4)
    assert outs["encoder_2"].shape == (2, 16, 4, 4)
    assert outs["encoder_3"].shape == (2, 32, 2, 2)
    assert outs["encoder_4"].shape == (2, 32, 2, 2)
    assert outs["output"].shape == (2, 32)

    ref = reference_forward(x, params)
    # Tolerances: conv outputs are compared tightly.  InstanceNorm outputs get a
    # wider band because the kernel uses bf16 conv operands and InstanceNorm
    # divides by the std of very small spatial groups (P=16, then P=4), which
    # amplifies the bf16 operand-rounding error of the upstream convs by 1/std.
    tols = {"encoder_0": 2e-2, "encoder_1": 2e-2, "encoder_2": 5e-2,
            "encoder_3": 2e-2, "encoder_4": 1.5e-1, "output": 5e-2}
    for name in sorted(outs):
        np.testing.assert_allclose(np.asarray(outs[name]), np.asarray(ref[name]),
                                   rtol=tols[name], atol=tols[name])

    print("KERNEL_OK")
</pallas_src>

<mosaic_0001>
module attributes {stable_mosaic.version = 11 : i64} {
  func.func @kernel(%arg0: i32, %arg1: memref<8x1024xf32, #tpu.memory_space<vmem>>, %arg2: memref<1024x512xbf16, #tpu.memory_space<vmem>>, %arg3: memref<1x512xf32, #tpu.memory_space<vmem>>, %arg4: memref<512x256xbf16, #tpu.memory_space<vmem>>, %arg5: memref<1x256xf32, #tpu.memory_space<vmem>>, %arg6: memref<256x256xbf16, #tpu.memory_space<vmem>>, %arg7: memref<256x128xbf16, #tpu.memory_space<vmem>>, %arg8: memref<1x128xf32, #tpu.memory_space<vmem>>, %arg9: memref<128x128xbf16, #tpu.memory_space<vmem>>, %arg10: memref<128x32xbf16, #tpu.memory_space<vmem>>, %arg11: memref<8x512xf32, #tpu.memory_space<vmem>>, %arg12: memref<8x256xf32, #tpu.memory_space<vmem>>, %arg13: memref<8x256xf32, #tpu.memory_space<vmem>>, %arg14: memref<8x128xf32, #tpu.memory_space<vmem>>, %arg15: memref<8x128xf32, #tpu.memory_space<vmem>>, %arg16: memref<8x32xf32, #tpu.memory_space<vmem>>) attributes {dimension_semantics = [#tpu.dimension_semantics<parallel>], iteration_bounds = array<i64: 1>, scalar_prefetch = 0 : i64, scratch_operands = 0 : i64, tpu.core_type = #tpu.core_type<tc>, window_params = [{transform_indices = @transform_0, window_bounds = array<i64: 8, 1024>}, {pipeline_mode = #tpu.pipeline_mode<synchronous>, transform_indices = @transform_1, window_bounds = array<i64: 1024, 512>}, {pipeline_mode = #tpu.pipeline_mode<synchronous>, transform_indices = @transform_2, window_bounds = array<i64: 1, 512>}, {pipeline_mode = #tpu.pipeline_mode<synchronous>, transform_indices = @transform_3, window_bounds = array<i64: 512, 256>}, {pipeline_mode = #tpu.pipeline_mode<synchronous>, transform_indices = @transform_4, window_bounds = array<i64: 1, 256>}, {pipeline_mode = #tpu.pipeline_mode<synchronous>, transform_indices = @transform_5, window_bounds = array<i64: 256, 256>}, {pipeline_mode = #tpu.pipeline_mode<synchronous>, transform_indices = @transform_6, window_bounds = array<i64: 256, 128>}, {pipeline_mode = #tpu.pipeline_mode<synchronous>, transform_indices = @transform_7, window_bounds = array<i64: 1, 128>}, {pipeline_mode = #tpu.pipeline_mode<synchronous>, transform_indices = @transform_8, window_bounds = array<i64: 128, 128>}, {pipeline_mode = #tpu.pipeline_mode<synchronous>, transform_indices = @transform_9, window_bounds = array<i64: 128, 32>}, {transform_indices = @transform_10, window_bounds = array<i64: 8, 512>}, {transform_indices = @transform_11, window_bounds = array<i64: 8, 256>}, {transform_indices = @transform_12, window_bounds = array<i64: 8, 256>}, {transform_indices = @transform_13, window_bounds = array<i64: 8, 128>}, {transform_indices = @transform_14, window_bounds = array<i64: 8, 128>}, {transform_indices = @transform_15, window_bounds = array<i64: 8, 32>}]} {
    %c0 = arith.constant 0 : index
    %c0_0 = arith.constant 0 : index
    %0 = vector.load %arg1[%c0, %c0_0] : memref<8x1024xf32, #tpu.memory_space<vmem>>, vector<8x1024xf32>
    %1 = arith.truncf %0 : vector<8x1024xf32> to vector<8x1024xbf16>
    %c0_1 = arith.constant 0 : index
    %c0_2 = arith.constant 0 : index
    %2 = vector.load %arg2[%c0_1, %c0_2] : memref<1024x512xbf16, #tpu.memory_space<vmem>>, vector<1024x512xbf16>
    %cst = arith.constant dense<0.000000e+00> : vector<8x512xf32>
    %3 = tpu.matmul %1, %2, %cst {dimension_numbers = #tpu.dot_dimension_numbers<[1], [0], [0], [1], [0, 0, 1, 1], [], []>} : vector<8x1024xbf16>, vector<1024x512xbf16>, vector<8x512xf32> -> vector<8x512xf32>
    %c0_3 = arith.constant 0 : index
    %c0_4 = arith.constant 0 : index
    %4 = vector.load %arg3[%c0_3, %c0_4] : memref<1x512xf32, #tpu.memory_space<vmem>>, vector<1x512xf32>
    %5 = vector.broadcast %4 : vector<1x512xf32> to vector<8x512xf32>
    %6 = arith.addf %3, %5 : vector<8x512xf32>
    %cst_5 = arith.constant 2.000000e-01 : f32
    %7 = vector.broadcast %cst_5 : f32 to vector<8x512xf32>
    %8 = arith.mulf %7, %6 : vector<8x512xf32>
    %9 = arith.maximumf %6, %8 : vector<8x512xf32>
    %c0_6 = arith.constant 0 : index
    %c0_7 = arith.constant 0 : index
    %10 = vector.load %arg11[%c0_6, %c0_7] : memref<8x512xf32, #tpu.memory_space<vmem>>, vector<8x512xf32>
    tpu.vector_store %arg11[%c0_6, %c0_7], %9 {strides = array<i32>} : memref<8x512xf32, #tpu.memory_space<vmem>>, vector<8x512xf32>,
    %c0_8 = arith.constant 0 : index
    %c0_9 = arith.constant 0 : index
    %11 = vector.load %arg4[%c0_8, %c0_9] : memref<512x256xbf16, #tpu.memory_space<vmem>>, vector<512x256xbf16>
    %c0_10 = arith.constant 0 : index
    %c0_11 = arith.constant 0 : index
    %12 = vector.load %arg5[%c0_10, %c0_11] : memref<1x256xf32, #tpu.memory_space<vmem>>, vector<1x256xf32>
    %c0_12 = arith.constant 0 : index
    %c0_13 = arith.constant 0 : index
    %13 = vector.load %arg6[%c0_12, %c0_13] : memref<256x256xbf16, #tpu.memory_space<vmem>>, vector<256x256xbf16>
    %14 = arith.extf %13 : vector<256x256xbf16> to vector<256x256xf32>
    %15 = arith.truncf %9 : vector<8x512xf32> to vector<8x512xbf16>
    %cst_14 = arith.constant dense<0.000000e+00> : vector<8x256xf32>
    %16 = tpu.matmul %15, %11, %cst_14 {dimension_numbers = #tpu.dot_dimension_numbers<[1], [0], [0], [1], [0, 0, 1, 1], [], []>} : vector<8x512xbf16>, vector<512x256xbf16>, vector<8x256xf32> -> vector<8x256xf32>
    %17 = vector.broadcast %12 : vector<1x256xf32> to vector<8x256xf32>
    %18 = arith.addf %16, %17 : vector<8x256xf32>
    %cst_15 = arith.constant 2.000000e-01 : f32
    %19 = vector.broadcast %cst_15 : f32 to vector<8x256xf32>
    %20 = arith.mulf %19, %18 : vector<8x256xf32>
    %21 = arith.maximumf %18, %20 : vector<8x256xf32>
    %c0_16 = arith.constant 0 : index
    %c0_17 = arith.constant 0 : index
    %22 = vector.load %arg12[%c0_16, %c0_17] : memref<8x256xf32, #tpu.memory_space<vmem>>, vector<8x256xf32>
    tpu.vector_store %arg12[%c0_16, %c0_17], %21 {strides = array<i32>} : memref<8x256xf32, #tpu.memory_space<vmem>>, vector<8x256xf32>,
    %cst_18 = arith.constant dense<0.000000e+00> : vector<8x256xf32>
    %23 = tpu.matmul %21, %14, %cst_18 {dimension_numbers = #tpu.dot_dimension_numbers<[1], [0], [0], [1], [0, 0, 1, 1], [], []>} : vector<8x256xf32>, vector<256x256xf32>, vector<8x256xf32> -> vector<8x256xf32>
    %24 = arith.mulf %21, %21 : vector<8x256xf32>
    %cst_19 = arith.constant dense<0.000000e+00> : vector<8x256xf32>
    %25 = tpu.matmul %24, %14, %cst_19 {dimension_numbers = #tpu.dot_dimension_numbers<[1], [0], [0], [1], [0, 0, 1, 1], [], []>} : vector<8x256xf32>, vector<256x256xf32>, vector<8x256xf32> -> vector<8x256xf32>
    %26 = arith.mulf %23, %23 : vector<8x256xf32>
    %27 = arith.subf %25, %26 : vector<8x256xf32>
    %cst_20 = arith.constant 0.000000e+00 : f32
    %28 = vector.broadcast %cst_20 : f32 to vector<8x256xf32>
    %29 = arith.maximumf %27, %28 : vector<8x256xf32>
    %30 = arith.subf %21, %23 : vector<8x256xf32>
    %cst_21 = arith.constant 9.99999997E-7 : f32
    %31 = vector.broadcast %cst_21 : f32 to vector<8x256xf32>
    %32 = arith.addf %29, %31 : vector<8x256xf32>
    %33 = math.rsqrt %32 : vector<8x256xf32>
    %34 = arith.mulf %30, %33 : vector<8x256xf32>
    %cst_22 = arith.constant 2.000000e-01 : f32
    %35 = vector.broadcast %cst_22 : f32 to vector<8x256xf32>
    %36 = arith.mulf %35, %34 : vector<8x256xf32>
    %37 = arith.maximumf %34, %36 : vector<8x256xf32>
    %c0_23 = arith.constant 0 : index
    %c0_24 = arith.constant 0 : index
    %38 = vector.load %arg13[%c0_23, %c0_24] : memref<8x256xf32, #tpu.memory_space<vmem>>, vector<8x256xf32>
    tpu.vector_store %arg13[%c0_23, %c0_24], %37 {strides = array<i32>} : memref<8x256xf32, #tpu.memory_space<vmem>>, vector<8x256xf32>,
    %c0_25 = arith.constant 0 : index
    %c0_26 = arith.constant 0 : index
    %39 = vector.load %arg7[%c0_25, %c0_26] : memref<256x128xbf16, #tpu.memory_space<vmem>>, vector<256x128xbf16>
    %c0_27 = arith.constant 0 : index
    %c0_28 = arith.constant 0 : index
    %40 = vector.load %arg8[%c0_27, %c0_28] : memref<1x128xf32, #tpu.memory_space<vmem>>, vector<1x128xf32>
    %c0_29 = arith.constant 0 : index
    %c0_30 = arith.constant 0 : index
    %41 = vector.load %arg9[%c0_29, %c0_30] : memref<128x128xbf16, #tpu.memory_space<vmem>>, vector<128x128xbf16>
    %42 = arith.extf %41 : vector<128x128xbf16> to vector<128x128xf32>
    %43 = arith.truncf %37 : vector<8x256xf32> to vector<8x256xbf16>
    %cst_31 = arith.constant dense<0.000000e+00> : vector<8x128xf32>
    %44 = tpu.matmul %43, %39, %cst_31 {dimension_numbers = #tpu.dot_dimension_numbers<[1], [0], [0], [1], [0, 0, 1, 1], [], []>} : vector<8x256xbf16>, vector<256x128xbf16>, vector<8x128xf32> -> vector<8x128xf32>
    %45 = vector.broadcast %40 : vector<1x128xf32> to vector<8x128xf32>
    %46 = arith.addf %44, %45 : vector<8x128xf32>
    %cst_32 = arith.constant 2.000000e-01 : f32
    %47 = vector.broadcast %cst_32 : f32 to vector<8x128xf32>
    %48 = arith.mulf %47, %46 : vector<8x128xf32>
    %49 = arith.maximumf %46, %48 : vector<8x128xf32>
    %c0_33 = arith.constant 0 : index
    %c0_34 = arith.constant 0 : index
    %50 = vector.load %arg14[%c0_33, %c0_34] : memref<8x128xf32, #tpu.memory_space<vmem>>, vector<8x128xf32>
    tpu.vector_store %arg14[%c0_33, %c0_34], %49 {strides = array<i32>} : memref<8x128xf32, #tpu.memory_space<vmem>>, vector<8x128xf32>,
    %cst_35 = arith.constant dense<0.000000e+00> : vector<8x128xf32>
    %51 = tpu.matmul %49, %42, %cst_35 {dimension_numbers = #tpu.dot_dimension_numbers<[1], [0], [0], [1], [0, 0, 1, 1], [], []>} : vector<8x128xf32>, vector<128x128xf32>, vector<8x128xf32> -> vector<8x128xf32>
    %52 = arith.mulf %49, %49 : vector<8x128xf32>
    %cst_36 = arith.constant dense<0.000000e+00> : vector<8x128xf32>
    %53 = tpu.matmul %52, %42, %cst_36 {dimension_numbers = #tpu.dot_dimension_numbers<[1], [0], [0], [1], [0, 0, 1, 1], [], []>} : vector<8x128xf32>, vector<128x128xf32>, vector<8x128xf32> -> vector<8x128xf32>
    %54 = arith.mulf %51, %51 : vector<8x128xf32>
    %55 = arith.subf %53, %54 : vector<8x128xf32>
    %cst_37 = arith.constant 0.000000e+00 : f32
    %56 = vector.broadcast %cst_37 : f32 to vector<8x128xf32>
    %57 = arith.maximumf %55, %56 : vector<8x128xf32>
    %58 = arith.subf %49, %51 : vector<8x128xf32>
    %cst_38 = arith.constant 9.99999997E-7 : f32
    %59 = vector.broadcast %cst_38 : f32 to vector<8x128xf32>
    %60 = arith.addf %57, %59 : vector<8x128xf32>
    %61 = math.rsqrt %60 : vector<8x128xf32>
    %62 = arith.mulf %58, %61 : vector<8x128xf32>
    %cst_39 = arith.constant 2.000000e-01 : f32
    %63 = vector.broadcast %cst_39 : f32 to vector<8x128xf32>
    %64 = arith.mulf %63, %62 : vector<8x128xf32>
    %65 = arith.maximumf %62, %64 : vector<8x128xf32>
    %c0_40 = arith.constant 0 : index
    %c0_41 = arith.constant 0 : index
    %66 = vector.load %arg15[%c0_40, %c0_41] : memref<8x128xf32, #tpu.memory_space<vmem>>, vector<8x128xf32>
    tpu.vector_store %arg15[%c0_40, %c0_41], %65 {strides = array<i32>} : memref<8x128xf32, #tpu.memory_space<vmem>>, vector<8x128xf32>,
    %c0_42 = arith.constant 0 : index
    %c0_43 = arith.constant 0 : index
    %67 = vector.load %arg10[%c0_42, %c0_43] : memref<128x32xbf16, #tpu.memory_space<vmem>>, vector<128x32xbf16>
    %68 = arith.extf %67 : vector<128x32xbf16> to vector<128x32xf32>
    %cst_44 = arith.constant dense<0.000000e+00> : vector<8x32xf32>
    %69 = tpu.matmul %65, %68, %cst_44 {dimension_numbers = #tpu.dot_dimension_numbers<[1], [0], [0], [1], [0, 0, 1, 1], [], []>} : vector<8x128xf32>, vector<128x32xf32>, vector<8x32xf32> -> vector<8x32xf32>
    %c0_45 = arith.constant 0 : index
    %c0_46 = arith.constant 0 : index
    %70 = vector.load %arg16[%c0_45, %c0_46] : memref<8x32xf32, #tpu.memory_space<vmem>>, vector<8x32xf32>
    tpu.vector_store %arg16[%c0_45, %c0_46], %69 {strides = array<i32>} : memref<8x32xf32, #tpu.memory_space<vmem>>, vector<8x32xf32>,
    return
  }
  func.func @transform_0(%arg0: i32) -> (i32, i32) {
    %c0_i32 = arith.constant 0 : i32
    %c0_i32_0 = arith.constant 0 : i32
    return %arg0, %c0_i32 : i32, i32
  }
  func.func @transform_1(%arg0: i32) -> (i32, i32) {
    %c0_i32 = arith.constant 0 : i32
    %c0_i32_0 = arith.constant 0 : i32
    %c0_i32_1 = arith.constant 0 : i32
    return %c0_i32, %c0_i32_0 : i32, i32
  }
  func.func @transform_2(%arg0: i32) -> (i32, i32) {
    %c0_i32 = arith.constant 0 : i32
    %c0_i32_0 = arith.constant 0 : i32
    %c0_i32_1 = arith.constant 0 : i32
    return %c0_i32, %c0_i32_0 : i32, i32
  }
  func.func @transform_3(%arg0: i32) -> (i32, i32) {
    %c0_i32 = arith.constant 0 : i32
    %c0_i32_0 = arith.constant 0 : i32
    %c0_i32_1 = arith.constant 0 : i32
    return %c0_i32, %c0_i32_0 : i32, i32
  }
  func.func @transform_4(%arg0: i32) -> (i32, i32) {
    %c0_i32 = arith.constant 0 : i32
    %c0_i32_0 = arith.constant 0 : i32
    %c0_i32_1 = arith.constant 0 : i32
    return %c0_i32, %c0_i32_0 : i32, i32
  }
  func.func @transform_5(%arg0: i32) -> (i32, i32) {
    %c0_i32 = arith.constant 0 : i32
    %c0_i32_0 = arith.constant 0 : i32
    %c0_i32_1 = arith.constant 0 : i32
    return %c0_i32, %c0_i32_0 : i32, i32
  }
  func.func @transform_6(%arg0: i32) -> (i32, i32) {
    %c0_i32 = arith.constant 0 : i32
    %c0_i32_0 = arith.constant 0 : i32
    %c0_i32_1 = arith.constant 0 : i32
    return %c0_i32, %c0_i32_0 : i32, i32
  }
  func.func @transform_7(%arg0: i32) -> (i32, i32) {
    %c0_i32 = arith.constant 0 : i32
    %c0_i32_0 = arith.constant 0 : i32
    %c0_i32_1 = arith.constant 0 : i32
    return %c0_i32, %c0_i32_0 : i32, i32
  }
  func.func @transform_8(%arg0: i32) -> (i32, i32) {
    %c0_i32 = arith.constant 0 : i32
    %c0_i32_0 = arith.constant 0 : i32
    %c0_i32_1 = arith.constant 0 : i32
    return %c0_i32, %c0_i32_0 : i32, i32
  }
  func.func @transform_9(%arg0: i32) -> (i32, i32) {
    %c0_i32 = arith.constant 0 : i32
    %c0_i32_0 = arith.constant 0 : i32
    %c0_i32_1 = arith.constant 0 : i32
    return %c0_i32, %c0_i32_0 : i32, i32
  }
  func.func @transform_10(%arg0: i32) -> (i32, i32) {
    %c0_i32 = arith.constant 0 : i32
    %c0_i32_0 = arith.constant 0 : i32
    return %arg0, %c0_i32 : i32, i32
  }
  func.func @transform_11(%arg0: i32) -> (i32, i32) {
    %c0_i32 = arith.constant 0 : i32
    %c0_i32_0 = arith.constant 0 : i32
    return %arg0, %c0_i32 : i32, i32
  }
  func.func @transform_12(%arg0: i32) -> (i32, i32) {
    %c0_i32 = arith.constant 0 : i32
    %c0_i32_0 = arith.constant 0 : i32
    return %arg0, %c0_i32 : i32, i32
  }
  func.func @transform_13(%arg0: i32) -> (i32, i32) {
    %c0_i32 = arith.constant 0 : i32
    %c0_i32_0 = arith.constant 0 : i32
    return %arg0, %c0_i32 : i32, i32
  }
  func.func @transform_14(%arg0: i32) -> (i32, i32) {
    %c0_i32 = arith.constant 0 : i32
    %c0_i32_0 = arith.constant 0 : i32
    return %arg0, %c0_i32 : i32, i32
  }
  func.func @transform_15(%arg0: i32) -> (i32, i32) {
    %c0_i32 = arith.constant 0 : i32
    %c0_i32_0 = arith.constant 0 : i32
    return %arg0, %c0_i32 : i32, i32
  }
}

</mosaic_0001>

<bundles_post_ra>
// kernel: forward.1
= control target key start
LH: loop header
LB: loop body
LE: loop exit
PB: predicated region body
PF: predicated region fallthrough
CT: control target
= control target key end

     0   :  { %21 = vsyncpa [#allocation3], 0  ;;  %s5300_s0 = inlined_call_operand.vmem [shape: f32[8,1024], index: 0, kind: input, shape index: {}]   ;;  %s5301_s1 = inlined_call_operand.hbm [shape: bf16[1024,512], index: 1, kind: input, shape index: {}]   ;;  %s5302_s2 = inlined_call_operand.vmem [shape: f32[1,512], index: 2, kind: input, shape index: {}]   ;;  %s5303_s3 = inlined_call_operand.hbm [shape: bf16[512,256], index: 3, kind: input, shape index: {}]   ;;  %s5304_s4 = inlined_call_operand.vmem [shape: f32[1,256], index: 4, kind: input, shape index: {}]   ;;  %s5305_s5 = inlined_call_operand.vmem [shape: bf16[256,256], index: 5, kind: input, shape index: {}]   ;;  %s5306_s6 = inlined_call_operand.hbm [shape: bf16[256,128], index: 6, kind: input, shape index: {}]   ;;  %s5307_s7 = inlined_call_operand.vmem [shape: f32[1,128], index: 7, kind: input, shape index: {}]   ;;  %s5308_s8 = inlined_call_operand.hbm [shape: bf16[128,128], index: 8, kind: input, shape index: {}]   ;;  %s5309_s9 = inlined_call_operand.vmem [shape: bf16[128,32], index: 9, kind: input, shape index: {}]   ;;  %s5310_s10 = inlined_call_operand.vmem [shape: f32[8,512], index: 10, kind: output, shape index: {0}]   ;;  %s5311_s11 = inlined_call_operand.vmem [shape: f32[8,256], index: 11, kind: output, shape index: {1}]   ;;  %s5312_s12 = inlined_call_operand.vmem [shape: f32[8,256], index: 12, kind: output, shape index: {2}]   ;;  %s5313_s13 = inlined_call_operand.vmem [shape: f32[8,128], index: 13, kind: output, shape index: {3}]   ;;  %s5314_s14 = inlined_call_operand.vmem [shape: f32[8,128], index: 14, kind: output, shape index: {4}]   ;;  %s5315_s15 = inlined_call_operand.vmem [shape: f32[8,32], index: 15, kind: output, shape index: {5}]  }
   0x1   :  { %22 = vsyncpa [#allocation5], 0 }
   0x2   :  { %23 = vsyncpa [#allocation8], 0  ;;  %s4801_s18 = smov [#allocation4]   ;;  %s4707_s22 = scalar_lea.hbm %s5303_s3, 8192 }
   0x3   :  { %s45_s19 = sshll.u32 %s4801_s18, 4  ;;  %p4708_p0 = scmp.ne.s32.totalorder %s5303_s3, %s4707_s22  ;;  %s46_s19 = int_to_ptr.vmem [resolvable:$true] %s45_s19 }
   0x4   :  { %p4711_p1 = scmp.lt.u32.totalorder %s4707_s22, %s5303_s3 }
   0x6   :  { %p4713_p2 = pnand %p4711_p1, %p4708_p0 }
   0x8   :  { %4716 = shalt.err (!%p4713_p2)
}
   0x9   :  { %s4717_s27 = scalar_lea.vmem %s46_s19, 8192  ;;  %p4722_p4 = scmp.lt.s32.totalorder %s46_s19, %s46_s19 }
   0xa   :  { %p4718_p3 = scmp.ne.s32.totalorder %s46_s19, %s4717_s27  ;;  %p4723_p5 = scmp.lt.s32.totalorder %s4717_s27, %s4717_s27 }
   0xc   :  { %p4724_p6 = por %p4723_p5, %p4722_p4 }
   0xe   :  { %p4725_p7 = pnand %p4724_p6, %p4718_p3 }
  0x10   :  { %4728 = shalt.err (!%p4725_p7)
}
  0x11   :  { %s4802_s28 = smov 128   ;;  %s4803_s29 = smov 8  }
  0x12   :  { %51 = dma.hbm_to_vmem [thread:$0]  %s5303_s3, 8192, %s46_s19, [#allocation5], %s4802_s28, %s4802_s28, %s4803_s29  }
  0x13   :  { %s4804_s17 = smov [#allocation2]   ;;  %s4729_s22 = scalar_lea.hbm %s5301_s1, 32768 }
  0x14   :  { %s31_s18 = sshll.u32 %s4804_s17, 4  ;;  %p4730_p8 = scmp.ne.s32.totalorder %s5301_s1, %s4729_s22  ;;  %s32_s18 = int_to_ptr.vmem [resolvable:$true] %s31_s18 }
  0x15   :  { %p4733_p9 = scmp.lt.u32.totalorder %s4729_s22, %s5301_s1 }
  0x17   :  { %p4735_p10 = pnand %p4733_p9, %p4730_p8 }
  0x19   :  { %4738 = shalt.err (!%p4735_p10)
}
  0x1a   :  { %s4739_s27 = scalar_lea.vmem %s32_s18, 32768  ;;  %p4744_p12 = scmp.lt.s32.totalorder %s32_s18, %s32_s18 }
  0x1b   :  { %p4740_p11 = scmp.ne.s32.totalorder %s32_s18, %s4739_s27  ;;  %p4745_p13 = scmp.lt.s32.totalorder %s4739_s27, %s4739_s27 }
  0x1d   :  { %p4746_p0 = por %p4745_p13, %p4744_p12 }
  0x1f   :  { %p4747_p1 = pnand %p4746_p0, %p4740_p11 }
  0x21   :  { %4750 = shalt.err (!%p4747_p1)
}
  0x22   :  { %s4805_s3 = smov 256   ;;  %s4806_s19 = smov 16  }
  0x23   :  { %37 = dma.hbm_to_vmem [thread:$0]  %s5301_s1, 32768, %s32_s18, [#allocation3], %s4805_s3, %s4805_s3, %s4806_s19  }
  0x24   :  { %s4807_s30 = smov [#allocation6]   ;;  %s4751_s21 = scalar_lea.hbm %s5306_s6, 2048 }
  0x25   :  { %s61_s16 = sshll.u32 %s4807_s30, 4  ;;  %p4752_p2 = scmp.ne.s32.totalorder %s5306_s6, %s4751_s21  ;;  %s62_s16 = int_to_ptr.vmem [resolvable:$true] %s61_s16 }
  0x26   :  { %p4755_p3 = scmp.lt.u32.totalorder %s4751_s21, %s5306_s6 }
  0x28   :  { %p4757_p4 = pnand %p4755_p3, %p4752_p2 }
  0x2a   :  { %4760 = shalt.err (!%p4757_p4)
}
  0x2b   :  { %s4761_s26 = scalar_lea.vmem %s62_s16, 2048  ;;  %p4766_p6 = scmp.lt.s32.totalorder %s62_s16, %s62_s16 }
  0x2c   :  { %p4762_p5 = scmp.ne.s32.totalorder %s62_s16, %s4761_s26  ;;  %p4767_p7 = scmp.lt.s32.totalorder %s4761_s26, %s4761_s26 }
  0x2e   :  { %p4768_p8 = por %p4767_p7, %p4766_p6 }
  0x30   :  { %p4769_p9 = pnand %p4768_p8, %p4762_p5 }
  0x32   :  { %4772 = shalt.err (!%p4769_p9)
}
  0x33   :  { %s4808_s1 = smov 64   ;;  %s4809_s18 = smov 4  }
  0x34   :  { %67 = dma.hbm_to_vmem [thread:$0]  %s5306_s6, 2048, %s62_s16, [#allocation5], %s4808_s1, %s4808_s1, %s4809_s18  }
  0x35   :  { %s4810_s19 = smov [#allocation7]   ;;  %s4773_s17 = scalar_lea.hbm %s5308_s8, 1024 }
  0x36   :  { %s75_s28 = sshll.u32 %s4810_s19, 4  ;;  %p4774_p10 = scmp.ne.s32.totalorder %s5308_s8, %s4773_s17  ;;  %s76_s28 = int_to_ptr.vmem [resolvable:$true] %s75_s28 }
  0x37   :  { %p4777_p11 = scmp.lt.u32.totalorder %s4773_s17, %s5308_s8 }
  0x39   :  { %p4779_p12 = pnand %p4777_p11, %p4774_p10 }
  0x3b   :  { %4782 = shalt.err (!%p4779_p12)
}
  0x3c   :  { %s4783_s24 = scalar_lea.vmem %s76_s28, 1024  ;;  %p4788_p0 = scmp.lt.s32.totalorder %s76_s28, %s76_s28 }
  0x3d   :  { %p4784_p13 = scmp.ne.s32.totalorder %s76_s28, %s4783_s24  ;;  %p4789_p1 = scmp.lt.s32.totalorder %s4783_s24, %s4783_s24 }
  0x3f   :  { %p4790_p2 = por %p4789_p1, %p4788_p0 }
  0x41   :  { %p4791_p3 = pnand %p4790_p2, %p4784_p13 }
  0x43   :  { %4794 = shalt.err (!%p4791_p3)
}
  0x44   :  { %81 = dma.hbm_to_vmem [thread:$0]  %s5308_s8, 1024, %s76_s28, [#allocation8], %s4808_s1, %s4808_s1, %s4809_s18  }
  0x45   :  { %4795 = dma.done.wait [#allocation3], 32768  }
  0x46   :  { %4796 = vsyncadd [#allocation3], 4294934528 }
  0x47   :  { %4797 = dma.done.wait [#allocation5], 10240  }
  0x48   :  { %4798 = vsyncadd [#allocation5], 4294957056 }
  0x49   :  { %4799 = dma.done.wait [#allocation8], 1024  }
  0x4a   :  { %4800 = vsyncadd [#allocation8], 4294966272  ;;  %v4157_v0 = vld [vmem:[#allocation2 + $0x4] ss:$16 sps:$4 sm:$0xff]   ;;  %v4159_v1 = vld [vmem:[#allocation2 + $0xc] ss:$16 sps:$4 sm:$0xff]  }
  0x4b   :  { %1671 = vmatprep.subr.bf16.mxu0 %v4157_v0  ;;  %v4161_v2 = vld [vmem:[#allocation2] ss:$16 sps:$4 sm:$0xff]   ;;  %v4162_v3 = vld [vmem:[#allocation2 + $0x8] ss:$16 sps:$4 sm:$0xff]   ;;  %1835 = vmatprep.subr.bf16.mxu1 %v4159_v1  ;;  %v4163_v4 = vld [vmem:[#allocation2 + $0x24] ss:$16 sps:$4 sm:$0xff]  }
  0x4c   :  { %1672 = vmatpush1.bf16.msra.mxu0 %v4161_v2  ;;  %1836 = vmatpush1.bf16.msra.mxu1 %v4162_v3  ;;  %v4165_v5 = vld [vmem:[#allocation2 + $0x2c] ss:$16 sps:$4 sm:$0xff]   ;;  %v4167_v6 = vld [vmem:[#allocation2 + $0x20] ss:$16 sps:$4 sm:$0xff]   ;;  %v4168_v7 = vld [vmem:[#allocation2 + $0x28] ss:$16 sps:$4 sm:$0xff]  }
  0x4d   :  { %1673 = vmatprep.subr.bf16.mxu0 %v4163_v4  ;;  %1837 = vmatprep.subr.bf16.mxu1 %v4165_v5  ;;  %v4169_v8 = vld [vmem:[#allocation2 + $0x44] ss:$16 sps:$4 sm:$0xff]   ;;  %v4171_v9 = vld [vmem:[#allocation2 + $0x4c] ss:$16 sps:$4 sm:$0xff]   ;;  %v4173_v10 = vld [vmem:[#allocation2 + $0x40] ss:$16 sps:$4 sm:$0xff]  }
  0x4e   :  { %v4174_v11 = vld [vmem:[#allocation2 + $0x48] ss:$16 sps:$4 sm:$0xff]   ;;  %v4175_v12 = vld [vmem:[#allocation2 + $0x64] ss:$16 sps:$4 sm:$0xff]   ;;  %v4177_v13 = vld [vmem:[#allocation2 + $0x6c] ss:$16 sps:$4 sm:$0xff]  }
  0x4f   :  { %v4179_v14 = vld [vmem:[#allocation2 + $0x60] ss:$16 sps:$4 sm:$0xff]   ;;  %v4180_v15 = vld [vmem:[#allocation2 + $0x68] ss:$16 sps:$4 sm:$0xff]   ;;  %v4181_v16 = vld [vmem:[#allocation2 + $0x84] ss:$16 sps:$4 sm:$0xff]  }
  0x50   :  { %1674 = vmatpush1.bf16.msra.mxu0 %v4167_v6  ;;  %1838 = vmatpush1.bf16.msra.mxu1 %v4168_v7  ;;  %v4183_v17 = vld [vmem:[#allocation2 + $0x8c] ss:$16 sps:$4 sm:$0xff]   ;;  %v4185_v18 = vld [vmem:[#allocation2 + $0x80] ss:$16 sps:$4 sm:$0xff]   ;;  %v4186_v19 = vld [vmem:[#allocation2 + $0x88] ss:$16 sps:$4 sm:$0xff]  }
  0x51   :  { %1675 = vmatprep.subr.bf16.mxu0 %v4169_v8  ;;  %1839 = vmatprep.subr.bf16.mxu1 %v4171_v9  ;;  %v4187_v20 = vld [vmem:[#allocation2 + $0xa4] ss:$16 sps:$4 sm:$0xff]   ;;  %v4189_v21 = vld [vmem:[#allocation2 + $0xac] ss:$16 sps:$4 sm:$0xff]   ;;  %v4191_v22 = vld [vmem:[#allocation2 + $0xa0] ss:$16 sps:$4 sm:$0xff]  }
  0x52   :  { %v4192_v23 = vld [vmem:[#allocation2 + $0xa8] ss:$16 sps:$4 sm:$0xff]   ;;  %v4193_v24 = vld [vmem:[#allocation2 + $0xc4] ss:$16 sps:$4 sm:$0xff]   ;;  %v4195_v25 = vld [vmem:[#allocation2 + $0xcc] ss:$16 sps:$4 sm:$0xff]  }
  0x53   :  { %v4197_v26 = vld [vmem:[#allocation2 + $0xc0] ss:$16 sps:$4 sm:$0xff]   ;;  %v4198_v27 = vld [vmem:[#allocation2 + $0xc8] ss:$16 sps:$4 sm:$0xff]   ;;  %v4199_v28 = vld [vmem:[#allocation2 + $0xe4] ss:$16 sps:$4 sm:$0xff]  }
  0x54   :  { %1676 = vmatpush1.bf16.msra.mxu0 %v4173_v10  ;;  %1840 = vmatpush1.bf16.msra.mxu1 %v4174_v11  ;;  %v4201_v29 = vld [vmem:[#allocation2 + $0xec] ss:$16 sps:$4 sm:$0xff]   ;;  %v4203_v30 = vld [vmem:[#allocation2 + $0xe0] ss:$16 sps:$4 sm:$0xff]   ;;  %v4204_v31 = vld [vmem:[#allocation2 + $0xe8] ss:$16 sps:$4 sm:$0xff]  }
  0x55   :  { %1677 = vmatprep.subr.bf16.mxu0 %v4175_v12  ;;  %1841 = vmatprep.subr.bf16.mxu1 %v4177_v13  ;;  %v4205_v32 = vld [vmem:[#allocation2 + $0x104] ss:$16 sps:$4 sm:$0xff]   ;;  %v4207_v33 = vld [vmem:[#allocation2 + $0x10c] ss:$16 sps:$4 sm:$0xff]   ;;  %v4209_v34 = vld [vmem:[#allocation2 + $0x100] ss:$16 sps:$4 sm:$0xff]  }
  0x56   :  { %v4210_v35 = vld [vmem:[#allocation2 + $0x108] ss:$16 sps:$4 sm:$0xff]   ;;  %v4211_v36 = vld [vmem:[#allocation2 + $0x124] ss:$16 sps:$4 sm:$0xff]   ;;  %v4213_v37 = vld [vmem:[#allocation2 + $0x12c] ss:$16 sps:$4 sm:$0xff]  }
  0x57   :  { %v4215_v38 = vld [vmem:[#allocation2 + $0x120] ss:$16 sps:$4 sm:$0xff]   ;;  %v4216_v39 = vld [vmem:[#allocation2 + $0x128] ss:$16 sps:$4 sm:$0xff]   ;;  %v4217_v40 = vld [vmem:[#allocation2 + $0x144] ss:$16 sps:$4 sm:$0xff]  }
  0x58   :  { %1678 = vmatpush1.bf16.msra.mxu0 %v4179_v14  ;;  %1842 = vmatpush1.bf16.msra.mxu1 %v4180_v15  ;;  %v4219_v41 = vld [vmem:[#allocation2 + $0x14c] ss:$16 sps:$4 sm:$0xff]   ;;  %v4221_v42 = vld [vmem:[#allocation2 + $0x140] ss:$16 sps:$4 sm:$0xff]   ;;  %v4222_v43 = vld [vmem:[#allocation2 + $0x148] ss:$16 sps:$4 sm:$0xff]  }
  0x59   :  { %1679 = vmatprep.subr.bf16.mxu0 %v4181_v16  ;;  %1843 = vmatprep.subr.bf16.mxu1 %v4183_v17  ;;  %v4223_v44 = vld [vmem:[#allocation2 + $0x164] ss:$16 sps:$4 sm:$0xff]   ;;  %v4225_v45 = vld [vmem:[#allocation2 + $0x16c] ss:$16 sps:$4 sm:$0xff]   ;;  %v4227_v47 = vld [vmem:[#allocation2 + $0x160] ss:$16 sps:$4 sm:$0xff]  }
  0x5a   :  { %v98_v46 = vld [vmem:[%s5300_s0 + $0x8] sm:$0xff]  ;;  %v4229_v50 = vld [vmem:[#allocation2 + $0x184] ss:$16 sps:$4 sm:$0xff]   ;;  %v4233_v52 = vld [vmem:[#allocation2 + $0x180] ss:$16 sps:$4 sm:$0xff]   ;;  %vm4812_vm0 = vmmov 0  }
  0x5b   :  { %v106_v48 = vpack.c.bf16 %v98_v46, %v98_v46  ;;  %v4228_v49 = vld [vmem:[#allocation2 + $0x168] ss:$16 sps:$4 sm:$0xff]   ;;  %v4231_v51 = vld [vmem:[#allocation2 + $0x18c] ss:$16 sps:$4 sm:$0xff]   ;;  %v4235_v54 = vld [vmem:[#allocation2 + $0x1a4] ss:$16 sps:$4 sm:$0xff]  }
  0x5c   :  { %1680 = vmatpush1.bf16.msra.mxu0 %v4185_v18  ;;  %1844 = vmatpush1.bf16.msra.mxu1 %v4186_v19  ;;  %v4234_v53 = vld [vmem:[#allocation2 + $0x188] ss:$16 sps:$4 sm:$0xff]   ;;  %v4237_v55 = vld [vmem:[#allocation2 + $0x1ac] ss:$16 sps:$4 sm:$0xff]   ;;  %v4239_v56 = vld [vmem:[#allocation2 + $0x1a0] ss:$16 sps:$4 sm:$0xff]  }
  0x5d   :  { %1681 = vmatprep.subr.bf16.mxu0 %v4187_v20  ;;  %1845 = vmatprep.subr.bf16.mxu1 %v4189_v21  ;;  %v4240_v57 = vld [vmem:[#allocation2 + $0x1a8] ss:$16 sps:$4 sm:$0xff]   ;;  %v4241_v58 = vld [vmem:[#allocation2 + $0x1c4] ss:$16 sps:$4 sm:$0xff]   ;;  %v4243_v59 = vld [vmem:[#allocation2 + $0x1cc] ss:$16 sps:$4 sm:$0xff]  }
  0x5e   :  { %1703 = vmatprep.mubr.bf16.mxu0 %v106_v48  ;;  %1867 = vmatprep.mubr.bf16.mxu1 %v106_v48  ;;  %v4245_v60 = vld [vmem:[#allocation2 + $0x1c0] ss:$16 sps:$4 sm:$0xff]   ;;  %v4246_v61 = vld [vmem:[#allocation2 + $0x1c8] ss:$16 sps:$4 sm:$0xff]   ;;  %v4247_v62 = vld [vmem:[#allocation2 + $0x1e4] ss:$16 sps:$4 sm:$0xff]  }
  0x5f   :  { %v4249_v63 = vld [vmem:[#allocation2 + $0x1ec] ss:$16 sps:$4 sm:$0xff]   ;;  %v4251_v0 = vld [vmem:[#allocation2 + $0x1e0] ss:$16 sps:$4 sm:$0xff]   ;;  %v4252_v1 = vld [vmem:[#allocation2 + $0x1e8] ss:$16 sps:$4 sm:$0xff]  }
  0x60   :  { %1682 = vmatpush1.bf16.msra.mxu0 %v4191_v22  ;;  %1846 = vmatpush1.bf16.msra.mxu1 %v4192_v23  ;;  %v97_v2 = vld [vmem:[%s5300_s0] sm:$0xff]  ;;  %v4258_v4 = vld [vmem:[#allocation2 + $0x20c] ss:$16 sps:$4 sm:$0xff]   ;;  %v4256_v7 = vld [vmem:[#allocation2 + $0x208] ss:$16 sps:$4 sm:$0xff]   ;;  %vm3224_vm1 = vcmask 261120  }
  0x61   :  { %1683 = vmatprep.subr.bf16.mxu0 %v4193_v24  ;;  %1847 = vmatprep.subr.bf16.mxu1 %v4195_v25  ;;  %v4255_v3 = vld [vmem:[#allocation2 + $0x204] ss:$16 sps:$4 sm:$0xff]   ;;  %v105_v5 = vpack.c.bf16 %v97_v2, %v97_v2  ;;  %v4253_v6 = vld [vmem:[#allocation2 + $0x200] ss:$16 sps:$4 sm:$0xff]   ;;  %v4264_v9 = vld [vmem:[#allocation2 + $0x22c] ss:$16 sps:$4 sm:$0xff]  }
  0x62   :  { %v4261_v8 = vld [vmem:[#allocation2 + $0x224] ss:$16 sps:$4 sm:$0xff]   ;;  %v4259_v10 = vld [vmem:[#allocation2 + $0x220] ss:$16 sps:$4 sm:$0xff]   ;;  %v4262_v11 = vld [vmem:[#allocation2 + $0x228] ss:$16 sps:$4 sm:$0xff]  }
  0x63   :  { %v4267_v12 = vld [vmem:[#allocation2 + $0x244] ss:$16 sps:$4 sm:$0xff]   ;;  %v4270_v13 = vld [vmem:[#allocation2 + $0x24c] ss:$16 sps:$4 sm:$0xff]   ;;  %v4265_v14 = vld [vmem:[#allocation2 + $0x240] ss:$16 sps:$4 sm:$0xff]  }
  0x64   :  { %1684 = vmatpush1.bf16.msra.mxu0 %v4197_v26  ;;  %1848 = vmatpush1.bf16.msra.mxu1 %v4198_v27  ;;  %v4268_v15 = vld [vmem:[#allocation2 + $0x248] ss:$16 sps:$4 sm:$0xff]   ;;  %v4273_v16 = vld [vmem:[#allocation2 + $0x264] ss:$16 sps:$4 sm:$0xff]   ;;  %v4276_v17 = vld [vmem:[#allocation2 + $0x26c] ss:$16 sps:$4 sm:$0xff]  }
  0x65   :  { %1685 = vmatprep.subr.bf16.mxu0 %v4199_v28  ;;  %1849 = vmatprep.subr.bf16.mxu1 %v4201_v29  ;;  %v4271_v18 = vld [vmem:[#allocation2 + $0x260] ss:$16 sps:$4 sm:$0xff]   ;;  %v4274_v19 = vld [vmem:[#allocation2 + $0x268] ss:$16 sps:$4 sm:$0xff]   ;;  %v4279_v20 = vld [vmem:[#allocation2 + $0x284] ss:$16 sps:$4 sm:$0xff]  }
  0x66   :  { %v4282_v21 = vld [vmem:[#allocation2 + $0x28c] ss:$16 sps:$4 sm:$0xff]   ;;  %v4277_v22 = vld [vmem:[#allocation2 + $0x280] ss:$16 sps:$4 sm:$0xff]   ;;  %v4280_v23 = vld [vmem:[#allocation2 + $0x288] ss:$16 sps:$4 sm:$0xff]  }
  0x67   :  { %v4285_v24 = vld [vmem:[#allocation2 + $0x2a4] ss:$16 sps:$4 sm:$0xff]   ;;  %v4288_v25 = vld [vmem:[#allocation2 + $0x2ac] ss:$16 sps:$4 sm:$0xff]   ;;  %v4283_v26 = vld [vmem:[#allocation2 + $0x2a0] ss:$16 sps:$4 sm:$0xff]  }
  0x68   :  { %1686 = vmatpush1.bf16.msra.mxu0 %v4203_v30  ;;  %1850 = vmatpush1.bf16.msra.mxu1 %v4204_v31  ;;  %v4286_v27 = vld [vmem:[#allocation2 + $0x2a8] ss:$16 sps:$4 sm:$0xff]   ;;  %v4291_v28 = vld [vmem:[#allocation2 + $0x2c4] ss:$16 sps:$4 sm:$0xff]   ;;  %v4294_v29 = vld [vmem:[#allocation2 + $0x2cc] ss:$16 sps:$4 sm:$0xff]  }
  0x69   :  { %1687 = vmatprep.subr.bf16.mxu0 %v4205_v32  ;;  %1851 = vmatprep.subr.bf16.mxu1 %v4207_v33  ;;  %v100_v30 = vld [vmem:[%s5300_s0 + $0x18] sm:$0xff]  ;;  %v4289_v31 = vld [vmem:[#allocation2 + $0x2c0] ss:$16 sps:$4 sm:$0xff]   ;;  %v4315_v46 = vld [vmem:[#allocation2 + $0x344] ss:$16 sps:$4 sm:$0xff]  }
  0x6a   :  { %v108_v32 = vpack.c.bf16 %v100_v30, %v100_v30  ;;  %v4292_v33 = vld [vmem:[#allocation2 + $0x2c8] ss:$16 sps:$4 sm:$0xff]   ;;  %v4313_v48 = vld [vmem:[#allocation2 + $0x340] ss:$16 sps:$4 sm:$0xff]   ;;  %v4345_v2 = vld [vmem:[#allocation2 + $0x3e4] ss:$16 sps:$4 sm:$0xff]  }
  0x6b   :  { %v4381_v30 = vld [vmem:[#allocation2 + $0x4a4] ss:$16 sps:$4 sm:$0xff]  }
  0x6c   :  { %1688 = vmatpush1.bf16.msra.mxu0 %v4209_v34  ;;  %1852 = vmatpush1.bf16.msra.mxu1 %v4210_v35  ;;  %v4297_v34 = vld [vmem:[#allocation2 + $0x2e4] ss:$16 sps:$4 sm:$0xff]   ;;  %v4300_v35 = vld [vmem:[#allocation2 + $0x2ec] ss:$16 sps:$4 sm:$0xff]  }
  0x6d   :  { %1689 = vmatprep.subr.bf16.mxu0 %v4211_v36  ;;  %1853 = vmatprep.subr.bf16.mxu1 %v4213_v37  ;;  %v4295_v36 = vld [vmem:[#allocation2 + $0x2e0] ss:$16 sps:$4 sm:$0xff]   ;;  %v4298_v37 = vld [vmem:[#allocation2 + $0x2e8] ss:$16 sps:$4 sm:$0xff]  }
  0x70   :  { %1690 = vmatpush1.bf16.msra.mxu0 %v4215_v38  ;;  %1854 = vmatpush1.bf16.msra.mxu1 %v4216_v39  ;;  %v4303_v38 = vld [vmem:[#allocation2 + $0x304] ss:$16 sps:$4 sm:$0xff]   ;;  %v4306_v39 = vld [vmem:[#allocation2 + $0x30c] ss:$16 sps:$4 sm:$0xff]  }
  0x71   :  { %1691 = vmatprep.subr.bf16.mxu0 %v4217_v40  ;;  %1855 = vmatprep.subr.bf16.mxu1 %v4219_v41  ;;  %v4301_v40 = vld [vmem:[#allocation2 + $0x300] ss:$16 sps:$4 sm:$0xff]   ;;  %v4304_v41 = vld [vmem:[#allocation2 + $0x308] ss:$16 sps:$4 sm:$0xff]  }
  0x74   :  { %1692 = vmatpush1.bf16.msra.mxu0 %v4221_v42  ;;  %1856 = vmatpush1.bf16.msra.mxu1 %v4222_v43  ;;  %v4309_v42 = vld [vmem:[#allocation2 + $0x324] ss:$16 sps:$4 sm:$0xff]   ;;  %v4312_v43 = vld [vmem:[#allocation2 + $0x32c] ss:$16 sps:$4 sm:$0xff]  }
  0x75   :  { %1693 = vmatprep.subr.bf16.mxu0 %v4223_v44  ;;  %1857 = vmatprep.subr.bf16.mxu1 %v4225_v45  ;;  %v4307_v44 = vld [vmem:[#allocation2 + $0x320] ss:$16 sps:$4 sm:$0xff]   ;;  %v4310_v45 = vld [vmem:[#allocation2 + $0x328] ss:$16 sps:$4 sm:$0xff]  }
  0x78   :  { %1694 = vmatpush1.bf16.msra.mxu0 %v4227_v47  ;;  %1858 = vmatpush1.bf16.msra.mxu1 %v4228_v49  ;;  %v4318_v47 = vld [vmem:[#allocation2 + $0x34c] ss:$16 sps:$4 sm:$0xff]   ;;  %v4316_v49 = vld [vmem:[#allocation2 + $0x348] ss:$16 sps:$4 sm:$0xff]  }
  0x79   :  { %1695 = vmatprep.subr.bf16.mxu0 %v4229_v50  ;;  %1859 = vmatprep.subr.bf16.mxu1 %v4231_v51  ;;  %v4321_v50 = vld [vmem:[#allocation2 + $0x364] ss:$16 sps:$4 sm:$0xff]   ;;  %v4324_v51 = vld [vmem:[#allocation2 + $0x36c] ss:$16 sps:$4 sm:$0xff]  }
  0x7c   :  { %1696 = vmatpush1.bf16.msra.mxu0 %v4233_v52  ;;  %1860 = vmatpush1.bf16.msra.mxu1 %v4234_v53  ;;  %v4319_v52 = vld [vmem:[#allocation2 + $0x360] ss:$16 sps:$4 sm:$0xff]   ;;  %v4322_v53 = vld [vmem:[#allocation2 + $0x368] ss:$16 sps:$4 sm:$0xff]  }
  0x7d   :  { %1697 = vmatprep.subr.bf16.mxu0 %v4235_v54  ;;  %1861 = vmatprep.subr.bf16.mxu1 %v4237_v55  ;;  %v4327_v54 = vld [vmem:[#allocation2 + $0x384] ss:$16 sps:$4 sm:$0xff]   ;;  %v4330_v55 = vld [vmem:[#allocation2 + $0x38c] ss:$16 sps:$4 sm:$0xff]  }
  0x80   :  { %1698 = vmatpush1.bf16.msra.mxu0 %v4239_v56  ;;  %1862 = vmatpush1.bf16.msra.mxu1 %v4240_v57  ;;  %v4325_v56 = vld [vmem:[#allocation2 + $0x380] ss:$16 sps:$4 sm:$0xff]   ;;  %v4328_v57 = vld [vmem:[#allocation2 + $0x388] ss:$16 sps:$4 sm:$0xff]  }
  0x81   :  { %1699 = vmatprep.subr.bf16.mxu0 %v4241_v58  ;;  %1863 = vmatprep.subr.bf16.mxu1 %v4243_v59  ;;  %v4333_v58 = vld [vmem:[#allocation2 + $0x3a4] ss:$16 sps:$4 sm:$0xff]   ;;  %v4336_v59 = vld [vmem:[#allocation2 + $0x3ac] ss:$16 sps:$4 sm:$0xff]  }
  0x84   :  { %1700 = vmatpush1.bf16.msra.mxu0 %v4245_v60  ;;  %1864 = vmatpush1.bf16.msra.mxu1 %v4246_v61  ;;  %v4331_v60 = vld [vmem:[#allocation2 + $0x3a0] ss:$16 sps:$4 sm:$0xff]   ;;  %v4334_v61 = vld [vmem:[#allocation2 + $0x3a8] ss:$16 sps:$4 sm:$0xff]  }
  0x85   :  { %1701 = vmatprep.subr.bf16.mxu0 %v4247_v62  ;;  %1865 = vmatprep.subr.bf16.mxu1 %v4249_v63  ;;  %v4339_v62 = vld [vmem:[#allocation2 + $0x3c4] ss:$16 sps:$4 sm:$0xff]   ;;  %v4342_v63 = vld [vmem:[#allocation2 + $0x3cc] ss:$16 sps:$4 sm:$0xff]  }
  0x88   :  { %1702 = vmatpush1.bf16.msra.mxu0 %v4251_v0  ;;  %1866 = vmatpush1.bf16.msra.mxu1 %v4252_v1  ;;  %v4337_v0 = vld [vmem:[#allocation2 + $0x3c0] ss:$16 sps:$4 sm:$0xff]   ;;  %v4340_v1 = vld [vmem:[#allocation2 + $0x3c8] ss:$16 sps:$4 sm:$0xff]  }
  0x89   :  { %1712 = vmatprep.subr.bf16.mxu0 %v4255_v3  ;;  %1876 = vmatprep.subr.bf16.mxu1 %v4258_v4  ;;  %v4348_v3 = vld [vmem:[#allocation2 + $0x3ec] ss:$16 sps:$4 sm:$0xff]   ;;  %v4343_v4 = vld [vmem:[#allocation2 + $0x3e0] ss:$16 sps:$4 sm:$0xff]  }
  0x8b   :  { %1704 = vmatmul.mubr.bf16.vlgmr.msra.gmra.mrb[0].mxu0 %v105_v5  ;;  %1868 = vmatmul.mubr.bf16.vlgmr.msra.gmra.mrb[0].mxu1 %v105_v5  ;;  %v4346_v5 = vld [vmem:[#allocation2 + $0x3e8] ss:$16 sps:$4 sm:$0xff]  }
  0x8c   :  { %1713 = vmatpush1.bf16.msra.mxu0 %v4253_v6  ;;  %1877 = vmatpush1.bf16.msra.mxu1 %v4256_v7  ;;  %v4351_v6 = vld [vmem:[#allocation2 + $0x404] ss:$16 sps:$4 sm:$0xff]  }
  0x8d   :  { %1714 = vmatprep.subr.bf16.mxu0 %v4261_v8  ;;  %1878 = vmatprep.subr.bf16.mxu1 %v4264_v9  ;;  %v99_v7 = vld [vmem:[%s5300_s0 + $0x10] sm:$0xff]  ;;  %v4354_v8 = vld [vmem:[#allocation2 + $0x40c] ss:$16 sps:$4 sm:$0xff]  }
  0x8e   :  { %1744 = vmatprep.mubr.bf16.mxu0 %v108_v32  ;;  %1908 = vmatprep.mubr.bf16.mxu1 %v108_v32  ;;  %v4349_v9 = vld [vmem:[#allocation2 + $0x400] ss:$16 sps:$4 sm:$0xff]  }
  0x8f   :  { %v4379_v32 = vld [vmem:[#allocation2 + $0x4a0] ss:$16 sps:$4 sm:$0xff]  }
  0x90   :  { %1715 = vmatpush1.bf16.msra.mxu0 %v4259_v10  ;;  %1879 = vmatpush1.bf16.msra.mxu1 %v4262_v11  ;;  %v4352_v10 = vld [vmem:[#allocation2 + $0x408] ss:$16 sps:$4 sm:$0xff]   ;;  %v107_v11 = vpack.c.bf16 %v99_v7, %v99_v7  ;;  %v4444_v7 = vld [vmem:[#allocation2 + $0x5ec] ss:$16 sps:$4 sm:$0xff]  }
  0x91   :  { %1716 = vmatprep.subr.bf16.mxu0 %v4267_v12  ;;  %1880 = vmatprep.subr.bf16.mxu1 %v4270_v13  ;;  %v4357_v12 = vld [vmem:[#allocation2 + $0x424] ss:$16 sps:$4 sm:$0xff]   ;;  %v4360_v13 = vld [vmem:[#allocation2 + $0x42c] ss:$16 sps:$4 sm:$0xff]  }
  0x94   :  { %1717 = vmatpush1.bf16.msra.mxu0 %v4265_v14  ;;  %1881 = vmatpush1.bf16.msra.mxu1 %v4268_v15  ;;  %v102_v14 = vld [vmem:[%s5300_s0 + $0x28] sm:$0xff] }
  0x95   :  { %1718 = vmatprep.subr.bf16.mxu0 %v4273_v16  ;;  %1882 = vmatprep.subr.bf16.mxu1 %v4276_v17  ;;  %v110_v15 = vpack.c.bf16 %v102_v14, %v102_v14  ;;  %v4355_v16 = vld [vmem:[#allocation2 + $0x420] ss:$16 sps:$4 sm:$0xff]   ;;  %v4358_v17 = vld [vmem:[#allocation2 + $0x428] ss:$16 sps:$4 sm:$0xff]  }
  0x96   :  { %v4448_v14 = vld [vmem:[#allocation2 + $0x608] ss:$16 sps:$4 sm:$0xff]  }
  0x98   :  { %1719 = vmatpush1.bf16.msra.mxu0 %v4271_v18  ;;  %1883 = vmatpush1.bf16.msra.mxu1 %v4274_v19  ;;  %v4363_v18 = vld [vmem:[#allocation2 + $0x444] ss:$16 sps:$4 sm:$0xff]   ;;  %v4366_v19 = vld [vmem:[#allocation2 + $0x44c] ss:$16 sps:$4 sm:$0xff]  }
  0x99   :  { %1720 = vmatprep.subr.bf16.mxu0 %v4279_v20  ;;  %1884 = vmatprep.subr.bf16.mxu1 %v4282_v21  ;;  %v4361_v20 = vld [vmem:[#allocation2 + $0x440] ss:$16 sps:$4 sm:$0xff]   ;;  %v4364_v21 = vld [vmem:[#allocation2 + $0x448] ss:$16 sps:$4 sm:$0xff]  }
  0x9c   :  { %1721 = vmatpush1.bf16.msra.mxu0 %v4277_v22  ;;  %1885 = vmatpush1.bf16.msra.mxu1 %v4280_v23  ;;  %v4369_v22 = vld [vmem:[#allocation2 + $0x464] ss:$16 sps:$4 sm:$0xff]   ;;  %v4372_v23 = vld [vmem:[#allocation2 + $0x46c] ss:$16 sps:$4 sm:$0xff]  }
  0x9d   :  { %1722 = vmatprep.subr.bf16.mxu0 %v4285_v24  ;;  %1886 = vmatprep.subr.bf16.mxu1 %v4288_v25  ;;  %v4367_v24 = vld [vmem:[#allocation2 + $0x460] ss:$16 sps:$4 sm:$0xff]   ;;  %v4370_v25 = vld [vmem:[#allocation2 + $0x468] ss:$16 sps:$4 sm:$0xff]  }
  0xa0   :  { %1723 = vmatpush1.bf16.msra.mxu0 %v4283_v26  ;;  %1887 = vmatpush1.bf16.msra.mxu1 %v4286_v27  ;;  %v4375_v26 = vld [vmem:[#allocation2 + $0x484] ss:$16 sps:$4 sm:$0xff]   ;;  %v4378_v27 = vld [vmem:[#allocation2 + $0x48c] ss:$16 sps:$4 sm:$0xff]  }
  0xa1   :  { %1724 = vmatprep.subr.bf16.mxu0 %v4291_v28  ;;  %1888 = vmatprep.subr.bf16.mxu1 %v4294_v29  ;;  %v4373_v28 = vld [vmem:[#allocation2 + $0x480] ss:$16 sps:$4 sm:$0xff]   ;;  %v4376_v29 = vld [vmem:[#allocation2 + $0x488] ss:$16 sps:$4 sm:$0xff]  }
  0xa4   :  { %1725 = vmatpush1.bf16.msra.mxu0 %v4289_v31  ;;  %1889 = vmatpush1.bf16.msra.mxu1 %v4292_v33  ;;  %v4384_v31 = vld [vmem:[#allocation2 + $0x4ac] ss:$16 sps:$4 sm:$0xff]   ;;  %v4382_v33 = vld [vmem:[#allocation2 + $0x4a8] ss:$16 sps:$4 sm:$0xff]  }
  0xa5   :  { %1726 = vmatprep.subr.bf16.mxu0 %v4297_v34  ;;  %1890 = vmatprep.subr.bf16.mxu1 %v4300_v35  ;;  %v4387_v34 = vld [vmem:[#allocation2 + $0x4c4] ss:$16 sps:$4 sm:$0xff]   ;;  %v4390_v35 = vld [vmem:[#allocation2 + $0x4cc] ss:$16 sps:$4 sm:$0xff]  }
  0xa8   :  { %1727 = vmatpush1.bf16.msra.mxu0 %v4295_v36  ;;  %1891 = vmatpush1.bf16.msra.mxu1 %v4298_v37  ;;  %v4385_v36 = vld [vmem:[#allocation2 + $0x4c0] ss:$16 sps:$4 sm:$0xff]   ;;  %v4388_v37 = vld [vmem:[#allocation2 + $0x4c8] ss:$16 sps:$4 sm:$0xff]  }
  0xa9   :  { %1728 = vmatprep.subr.bf16.mxu0 %v4303_v38  ;;  %1892 = vmatprep.subr.bf16.mxu1 %v4306_v39  ;;  %v4393_v38 = vld [vmem:[#allocation2 + $0x4e4] ss:$16 sps:$4 sm:$0xff]   ;;  %v4396_v39 = vld [vmem:[#allocation2 + $0x4ec] ss:$16 sps:$4 sm:$0xff]  }
  0xac   :  { %1729 = vmatpush1.bf16.msra.mxu0 %v4301_v40  ;;  %1893 = vmatpush1.bf16.msra.mxu1 %v4304_v41  ;;  %v4391_v40 = vld [vmem:[#allocation2 + $0x4e0] ss:$16 sps:$4 sm:$0xff]   ;;  %v4394_v41 = vld [vmem:[#allocation2 + $0x4e8] ss:$16 sps:$4 sm:$0xff]  }
  0xad   :  { %1730 = vmatprep.subr.bf16.mxu0 %v4309_v42  ;;  %1894 = vmatprep.subr.bf16.mxu1 %v4312_v43  ;;  %v4399_v42 = vld [vmem:[#allocation2 + $0x504] ss:$16 sps:$4 sm:$0xff]   ;;  %v4402_v43 = vld [vmem:[#allocation2 + $0x50c] ss:$16 sps:$4 sm:$0xff]  }
  0xb0   :  { %1731 = vmatpush1.bf16.msra.mxu0 %v4307_v44  ;;  %1895 = vmatpush1.bf16.msra.mxu1 %v4310_v45  ;;  %v4397_v44 = vld [vmem:[#allocation2 + $0x500] ss:$16 sps:$4 sm:$0xff]   ;;  %v4400_v45 = vld [vmem:[#allocation2 + $0x508] ss:$16 sps:$4 sm:$0xff]  }
  0xb1   :  { %1732 = vmatprep.subr.bf16.mxu0 %v4315_v46  ;;  %1896 = vmatprep.subr.bf16.mxu1 %v4318_v47  ;;  %v4405_v46 = vld [vmem:[#allocation2 + $0x524] ss:$16 sps:$4 sm:$0xff]   ;;  %v4408_v47 = vld [vmem:[#allocation2 + $0x52c] ss:$16 sps:$4 sm:$0xff]  }
  0xb4   :  { %1733 = vmatpush1.bf16.msra.mxu0 %v4313_v48  ;;  %1897 = vmatpush1.bf16.msra.mxu1 %v4316_v49  ;;  %v4403_v48 = vld [vmem:[#allocation2 + $0x520] ss:$16 sps:$4 sm:$0xff]   ;;  %v4406_v49 = vld [vmem:[#allocation2 + $0x528] ss:$16 sps:$4 sm:$0xff]  }
  0xb5   :  { %1734 = vmatprep.subr.bf16.mxu0 %v4321_v50  ;;  %1898 = vmatprep.subr.bf16.mxu1 %v4324_v51  ;;  %v4411_v50 = vld [vmem:[#allocation2 + $0x544] ss:$16 sps:$4 sm:$0xff]   ;;  %v4414_v51 = vld [vmem:[#allocation2 + $0x54c] ss:$16 sps:$4 sm:$0xff]  }
  0xb8   :  { %1735 = vmatpush1.bf16.msra.mxu0 %v4319_v52  ;;  %1899 = vmatpush1.bf16.msra.mxu1 %v4322_v53  ;;  %v4409_v52 = vld [vmem:[#allocation2 + $0x540] ss:$16 sps:$4 sm:$0xff]   ;;  %v4412_v53 = vld [vmem:[#allocation2 + $0x548] ss:$16 sps:$4 sm:$0xff]  }
  0xb9   :  { %1736 = vmatprep.subr.bf16.mxu0 %v4327_v54  ;;  %1900 = vmatprep.subr.bf16.mxu1 %v4330_v55  ;;  %v4417_v54 = vld [vmem:[#allocation2 + $0x564] ss:$16 sps:$4 sm:$0xff]   ;;  %v4420_v55 = vld [vmem:[#allocation2 + $0x56c] ss:$16 sps:$4 sm:$0xff]  }
  0xbc   :  { %1737 = vmatpush1.bf16.msra.mxu0 %v4325_v56  ;;  %1901 = vmatpush1.bf16.msra.mxu1 %v4328_v57  ;;  %v4415_v56 = vld [vmem:[#allocation2 + $0x560] ss:$16 sps:$4 sm:$0xff]   ;;  %v4418_v57 = vld [vmem:[#allocation2 + $0x568] ss:$16 sps:$4 sm:$0xff]  }
  0xbd   :  { %1738 = vmatprep.subr.bf16.mxu0 %v4333_v58  ;;  %1902 = vmatprep.subr.bf16.mxu1 %v4336_v59  ;;  %v4423_v58 = vld [vmem:[#allocation2 + $0x584] ss:$16 sps:$4 sm:$0xff]   ;;  %v4426_v59 = vld [vmem:[#allocation2 + $0x58c] ss:$16 sps:$4 sm:$0xff]  }
  0xc0   :  { %1739 = vmatpush1.bf16.msra.mxu0 %v4331_v60  ;;  %1903 = vmatpush1.bf16.msra.mxu1 %v4334_v61  ;;  %v4421_v60 = vld [vmem:[#allocation2 + $0x580] ss:$16 sps:$4 sm:$0xff]   ;;  %v4424_v61 = vld [vmem:[#allocation2 + $0x588] ss:$16 sps:$4 sm:$0xff]  }
  0xc1   :  { %1740 = vmatprep.subr.bf16.mxu0 %v4339_v62  ;;  %1904 = vmatprep.subr.bf16.mxu1 %v4342_v63  ;;  %v4429_v62 = vld [vmem:[#allocation2 + $0x5a4] ss:$16 sps:$4 sm:$0xff]   ;;  %v4432_v63 = vld [vmem:[#allocation2 + $0x5ac] ss:$16 sps:$4 sm:$0xff]  }
  0xc4   :  { %1741 = vmatpush1.bf16.msra.mxu0 %v4337_v0  ;;  %1905 = vmatpush1.bf16.msra.mxu1 %v4340_v1  ;;  %v4427_v0 = vld [vmem:[#allocation2 + $0x5a0] ss:$16 sps:$4 sm:$0xff]   ;;  %v4430_v1 = vld [vmem:[#allocation2 + $0x5a8] ss:$16 sps:$4 sm:$0xff]  }
  0xc5   :  { %1742 = vmatprep.subr.bf16.mxu0 %v4345_v2  ;;  %1906 = vmatprep.subr.bf16.mxu1 %v4348_v3  ;;  %v4435_v2 = vld [vmem:[#allocation2 + $0x5c4] ss:$16 sps:$4 sm:$0xff]   ;;  %v4438_v3 = vld [vmem:[#allocation2 + $0x5cc] ss:$16 sps:$4 sm:$0xff]  }
  0xc8   :  { %1743 = vmatpush1.bf16.msra.mxu0 %v4343_v4  ;;  %1907 = vmatpush1.bf16.msra.mxu1 %v4346_v5  ;;  %v4433_v4 = vld [vmem:[#allocation2 + $0x5c0] ss:$16 sps:$4 sm:$0xff]   ;;  %v4436_v5 = vld [vmem:[#allocation2 + $0x5c8] ss:$16 sps:$4 sm:$0xff]  }
  0xc9   :  { %1753 = vmatprep.subr.bf16.mxu0 %v4351_v6  ;;  %1917 = vmatprep.subr.bf16.mxu1 %v4354_v8  ;;  %v4441_v6 = vld [vmem:[#allocation2 + $0x5e4] ss:$16 sps:$4 sm:$0xff]   ;;  %v4439_v8 = vld [vmem:[#allocation2 + $0x5e0] ss:$16 sps:$4 sm:$0xff]  }
  0xcb   :  { %1745 = vmatmul.mubr.bf16.vlgmr.msra.gmra.mrb[0].mxu0 %v107_v11  ;;  %1909 = vmatmul.mubr.bf16.vlgmr.msra.gmra.mrb[0].mxu1 %v107_v11  ;;  %v101_v11 = vld [vmem:[%s5300_s0 + $0x20] sm:$0xff] }
  0xcc   :  { %1754 = vmatpush1.bf16.msra.mxu0 %v4349_v9  ;;  %1918 = vmatpush1.bf16.msra.mxu1 %v4352_v10  ;;  %v4442_v9 = vld [vmem:[#allocation2 + $0x5e8] ss:$16 sps:$4 sm:$0xff]   ;;  %v4447_v10 = vld [vmem:[#allocation2 + $0x604] ss:$16 sps:$4 sm:$0xff]  }
  0xcd   :  { %1755 = vmatprep.subr.bf16.mxu0 %v4357_v12  ;;  %1919 = vmatprep.subr.bf16.mxu1 %v4360_v13  ;;  %v4450_v12 = vld [vmem:[#allocation2 + $0x60c] ss:$16 sps:$4 sm:$0xff]   ;;  %v4445_v13 = vld [vmem:[#allocation2 + $0x600] ss:$16 sps:$4 sm:$0xff]  }
  0xce   :  { %1785 = vmatprep.mubr.bf16.mxu0 %v110_v15  ;;  %1949 = vmatprep.mubr.bf16.mxu1 %v110_v15  ;;  %v109_v15 = vpack.c.bf16 %v101_v11, %v101_v11  ;;  %v4540_v11 = vld [vmem:[#allocation2 + $0x7ec] ss:$16 sps:$4 sm:$0xff]  }
  0xd0   :  { %1756 = vmatpush1.bf16.msra.mxu0 %v4355_v16  ;;  %1920 = vmatpush1.bf16.msra.mxu1 %v4358_v17  ;;  %v4453_v16 = vld [vmem:[#allocation2 + $0x624] ss:$16 sps:$4 sm:$0xff]   ;;  %v104_v17 = vld [vmem:[%s5300_s0 + $0x38] sm:$0xff] }
  0xd1   :  { %1757 = vmatprep.subr.bf16.mxu0 %v4363_v18  ;;  %1921 = vmatprep.subr.bf16.mxu1 %v4366_v19  ;;  %v4456_v18 = vld [vmem:[#allocation2 + $0x62c] ss:$16 sps:$4 sm:$0xff]   ;;  %v4451_v19 = vld [vmem:[#allocation2 + $0x620] ss:$16 sps:$4 sm:$0xff]  }
  0xd4   :  { %1758 = vmatpush1.bf16.msra.mxu0 %v4361_v20  ;;  %1922 = vmatpush1.bf16.msra.mxu1 %v4364_v21  ;;  %v4454_v20 = vld [vmem:[#allocation2 + $0x628] ss:$16 sps:$4 sm:$0xff]   ;;  %v112_v21 = vpack.c.bf16 %v104_v17, %v104_v17 }
  0xd5   :  { %1759 = vmatprep.subr.bf16.mxu0 %v4369_v22  ;;  %1923 = vmatprep.subr.bf16.mxu1 %v4372_v23  ;;  %v4459_v22 = vld [vmem:[#allocation2 + $0x644] ss:$16 sps:$4 sm:$0xff]   ;;  %v4462_v23 = vld [vmem:[#allocation2 + $0x64c] ss:$16 sps:$4 sm:$0xff]   ;;  %v4541_v17 = vld [vmem:[#allocation4] ss:$8 sps:$4 sm:$0xff]  }
  0xd8   :  { %1760 = vmatpush1.bf16.msra.mxu0 %v4367_v24  ;;  %1924 = vmatpush1.bf16.msra.mxu1 %v4370_v25  ;;  %v4457_v24 = vld [vmem:[#allocation2 + $0x640] ss:$16 sps:$4 sm:$0xff]   ;;  %v4460_v25 = vld [vmem:[#allocation2 + $0x648] ss:$16 sps:$4 sm:$0xff]  }
  0xd9   :  { %1761 = vmatprep.subr.bf16.mxu0 %v4375_v26  ;;  %1925 = vmatprep.subr.bf16.mxu1 %v4378_v27  ;;  %v4465_v26 = vld [vmem:[#allocation2 + $0x664] ss:$16 sps:$4 sm:$0xff]   ;;  %v4468_v27 = vld [vmem:[#allocation2 + $0x66c] ss:$16 sps:$4 sm:$0xff]  }
  0xdc   :  { %1762 = vmatpush1.bf16.msra.mxu0 %v4373_v28  ;;  %1926 = vmatpush1.bf16.msra.mxu1 %v4376_v29  ;;  %v4463_v28 = vld [vmem:[#allocation2 + $0x660] ss:$16 sps:$4 sm:$0xff]   ;;  %v4466_v29 = vld [vmem:[#allocation2 + $0x668] ss:$16 sps:$4 sm:$0xff]  }
  0xdd   :  { %1763 = vmatprep.subr.bf16.mxu0 %v4381_v30  ;;  %1927 = vmatprep.subr.bf16.mxu1 %v4384_v31  ;;  %v4471_v30 = vld [vmem:[#allocation2 + $0x684] ss:$16 sps:$4 sm:$0xff]   ;;  %v4474_v31 = vld [vmem:[#allocation2 + $0x68c] ss:$16 sps:$4 sm:$0xff]  }
  0xe0   :  { %1764 = vmatpush1.bf16.msra.mxu0 %v4379_v32  ;;  %1928 = vmatpush1.bf16.msra.mxu1 %v4382_v33  ;;  %v4469_v32 = vld [vmem:[#allocation2 + $0x680] ss:$16 sps:$4 sm:$0xff]   ;;  %v4472_v33 = vld [vmem:[#allocation2 + $0x688] ss:$16 sps:$4 sm:$0xff]  }
  0xe1   :  { %1765 = vmatprep.subr.bf16.mxu0 %v4387_v34  ;;  %1929 = vmatprep.subr.bf16.mxu1 %v4390_v35  ;;  %v4477_v34 = vld [vmem:[#allocation2 + $0x6a4] ss:$16 sps:$4 sm:$0xff]   ;;  %v4480_v35 = vld [vmem:[#allocation2 + $0x6ac] ss:$16 sps:$4 sm:$0xff]  }
  0xe4   :  { %1766 = vmatpush1.bf16.msra.mxu0 %v4385_v36  ;;  %1930 = vmatpush1.bf16.msra.mxu1 %v4388_v37  ;;  %v4475_v36 = vld [vmem:[#allocation2 + $0x6a0] ss:$16 sps:$4 sm:$0xff]   ;;  %v4478_v37 = vld [vmem:[#allocation2 + $0x6a8] ss:$16 sps:$4 sm:$0xff]  }
  0xe5   :  { %1767 = vmatprep.subr.bf16.mxu0 %v4393_v38  ;;  %1931 = vmatprep.subr.bf16.mxu1 %v4396_v39  ;;  %v4483_v38 = vld [vmem:[#allocation2 + $0x6c4] ss:$16 sps:$4 sm:$0xff]   ;;  %v4486_v39 = vld [vmem:[#allocation2 + $0x6cc] ss:$16 sps:$4 sm:$0xff]  }
  0xe8   :  { %1768 = vmatpush1.bf16.msra.mxu0 %v4391_v40  ;;  %1932 = vmatpush1.bf16.msra.mxu1 %v4394_v41  ;;  %v4481_v40 = vld [vmem:[#allocation2 + $0x6c0] ss:$16 sps:$4 sm:$0xff]   ;;  %v4484_v41 = vld [vmem:[#allocation2 + $0x6c8] ss:$16 sps:$4 sm:$0xff]  }
  0xe9   :  { %1769 = vmatprep.subr.bf16.mxu0 %v4399_v42  ;;  %1933 = vmatprep.subr.bf16.mxu1 %v4402_v43  ;;  %v4489_v42 = vld [vmem:[#allocation2 + $0x6e4] ss:$16 sps:$4 sm:$0xff]   ;;  %v4492_v43 = vld [vmem:[#allocation2 + $0x6ec] ss:$16 sps:$4 sm:$0xff]  }
  0xec   :  { %1770 = vmatpush1.bf16.msra.mxu0 %v4397_v44  ;;  %1934 = vmatpush1.bf16.msra.mxu1 %v4400_v45  ;;  %v4487_v44 = vld [vmem:[#allocation2 + $0x6e0] ss:$16 sps:$4 sm:$0xff]   ;;  %v4490_v45 = vld [vmem:[#allocation2 + $0x6e8] ss:$16 sps:$4 sm:$0xff]  }
  0xed   :  { %1771 = vmatprep.subr.bf16.mxu0 %v4405_v46  ;;  %1935 = vmatprep.subr.bf16.mxu1 %v4408_v47  ;;  %v4495_v46 = vld [vmem:[#allocation2 + $0x704] ss:$16 sps:$4 sm:$0xff]   ;;  %v4498_v47 = vld [vmem:[#allocation2 + $0x70c] ss:$16 sps:$4 sm:$0xff]  }
  0xf0   :  { %1772 = vmatpush1.bf16.msra.mxu0 %v4403_v48  ;;  %1936 = vmatpush1.bf16.msra.mxu1 %v4406_v49  ;;  %v4493_v48 = vld [vmem:[#allocation2 + $0x700] ss:$16 sps:$4 sm:$0xff]   ;;  %v4496_v49 = vld [vmem:[#allocation2 + $0x708] ss:$16 sps:$4 sm:$0xff]  }
  0xf1   :  { %1773 = vmatprep.subr.bf16.mxu0 %v4411_v50  ;;  %1937 = vmatprep.subr.bf16.mxu1 %v4414_v51  ;;  %v4501_v50 = vld [vmem:[#allocation2 + $0x724] ss:$16 sps:$4 sm:$0xff]   ;;  %v4504_v51 = vld [vmem:[#allocation2 + $0x72c] ss:$16 sps:$4 sm:$0xff]  }
  0xf4   :  { %1774 = vmatpush1.bf16.msra.mxu0 %v4409_v52  ;;  %1938 = vmatpush1.bf16.msra.mxu1 %v4412_v53  ;;  %v4499_v52 = vld [vmem:[#allocation2 + $0x720] ss:$16 sps:$4 sm:$0xff]   ;;  %v4502_v53 = vld [vmem:[#allocation2 + $0x728] ss:$16 sps:$4 sm:$0xff]  }
  0xf5   :  { %1775 = vmatprep.subr.bf16.mxu0 %v4417_v54  ;;  %1939 = vmatprep.subr.bf16.mxu1 %v4420_v55  ;;  %v4507_v54 = vld [vmem:[#allocation2 + $0x744] ss:$16 sps:$4 sm:$0xff]   ;;  %v4510_v55 = vld [vmem:[#allocation2 + $0x74c] ss:$16 sps:$4 sm:$0xff]  }
  0xf8   :  { %1776 = vmatpush1.bf16.msra.mxu0 %v4415_v56  ;;  %1940 = vmatpush1.bf16.msra.mxu1 %v4418_v57  ;;  %v4505_v56 = vld [vmem:[#allocation2 + $0x740] ss:$16 sps:$4 sm:$0xff]   ;;  %v4508_v57 = vld [vmem:[#allocation2 + $0x748] ss:$16 sps:$4 sm:$0xff]  }
  0xf9   :  { %1777 = vmatprep.subr.bf16.mxu0 %v4423_v58  ;;  %1941 = vmatprep.subr.bf16.mxu1 %v4426_v59  ;;  %v4513_v58 = vld [vmem:[#allocation2 + $0x764] ss:$16 sps:$4 sm:$0xff]   ;;  %v4516_v59 = vld [vmem:[#allocation2 + $0x76c] ss:$16 sps:$4 sm:$0xff]  }
  0xfc   :  { %1778 = vmatpush1.bf16.msra.mxu0 %v4421_v60  ;;  %1942 = vmatpush1.bf16.msra.mxu1 %v4424_v61  ;;  %v4511_v60 = vld [vmem:[#allocation2 + $0x760] ss:$16 sps:$4 sm:$0xff]   ;;  %v4514_v61 = vld [vmem:[#allocation2 + $0x768] ss:$16 sps:$4 sm:$0xff]  }
  0xfd   :  { %1779 = vmatprep.subr.bf16.mxu0 %v4429_v62  ;;  %1943 = vmatprep.subr.bf16.mxu1 %v4432_v63  ;;  %v4519_v62 = vld [vmem:[#allocation2 + $0x784] ss:$16 sps:$4 sm:$0xff]   ;;  %v4522_v63 = vld [vmem:[#allocation2 + $0x78c] ss:$16 sps:$4 sm:$0xff]  }
 0x100   :  { %1780 = vmatpush1.bf16.msra.mxu0 %v4427_v0  ;;  %1944 = vmatpush1.bf16.msra.mxu1 %v4430_v1  ;;  %v4517_v0 = vld [vmem:[#allocation2 + $0x780] ss:$16 sps:$4 sm:$0xff]   ;;  %v4520_v1 = vld [vmem:[#allocation2 + $0x788] ss:$16 sps:$4 sm:$0xff]  }
 0x101   :  { %1781 = vmatprep.subr.bf16.mxu0 %v4435_v2  ;;  %1945 = vmatprep.subr.bf16.mxu1 %v4438_v3  ;;  %v4525_v2 = vld [vmem:[#allocation2 + $0x7a4] ss:$16 sps:$4 sm:$0xff]   ;;  %v4528_v3 = vld [vmem:[#allocation2 + $0x7ac] ss:$16 sps:$4 sm:$0xff]  }
 0x104   :  { %1782 = vmatpush1.bf16.msra.mxu0 %v4433_v4  ;;  %1946 = vmatpush1.bf16.msra.mxu1 %v4436_v5  ;;  %v4523_v4 = vld [vmem:[#allocation2 + $0x7a0] ss:$16 sps:$4 sm:$0xff]   ;;  %v4526_v5 = vld [vmem:[#allocation2 + $0x7a8] ss:$16 sps:$4 sm:$0xff]  }
 0x105   :  { %1783 = vmatprep.subr.bf16.mxu0 %v4441_v6  ;;  %1947 = vmatprep.subr.bf16.mxu1 %v4444_v7  ;;  %v4531_v6 = vld [vmem:[#allocation2 + $0x7c4] ss:$16 sps:$4 sm:$0xff]   ;;  %v4534_v7 = vld [vmem:[#allocation2 + $0x7cc] ss:$16 sps:$4 sm:$0xff]  }
 0x108   :  { %1784 = vmatpush1.bf16.msra.mxu0 %v4439_v8  ;;  %1948 = vmatpush1.bf16.msra.mxu1 %v4442_v9  ;;  %v4529_v8 = vld [vmem:[#allocation2 + $0x7c0] ss:$16 sps:$4 sm:$0xff]   ;;  %v4532_v9 = vld [vmem:[#allocation2 + $0x7c8] ss:$16 sps:$4 sm:$0xff]  }
 0x109   :  { %1794 = vmatprep.subr.bf16.mxu0 %v4447_v10  ;;  %1958 = vmatprep.subr.bf16.mxu1 %v4450_v12  ;;  %v4537_v10 = vld [vmem:[#allocation2 + $0x7e4] ss:$16 sps:$4 sm:$0xff]   ;;  %v4535_v12 = vld [vmem:[#allocation2 + $0x7e0] ss:$16 sps:$4 sm:$0xff]  }
 0x10b   :  { %1786 = vmatmul.mubr.bf16.vlgmr.msra.gmra.mrb[0].mxu0 %v109_v15  ;;  %1950 = vmatmul.mubr.bf16.vlgmr.msra.gmra.mrb[0].mxu1 %v109_v15  ;;  %v4543_v15 = vld [vmem:[#allocation4 + $0x4] ss:$8 sps:$4 sm:$0xff]  }
 0x10c   :  { %1795 = vmatpush1.bf16.msra.mxu0 %v4445_v13  ;;  %1959 = vmatpush1.bf16.msra.mxu1 %v4448_v14  ;;  %v4538_v13 = vld [vmem:[#allocation2 + $0x7e8] ss:$16 sps:$4 sm:$0xff]   ;;  %v103_v14 = vld [vmem:[%s5300_s0 + $0x30] sm:$0xff] }
 0x10d   :  { %1796 = vmatprep.subr.bf16.mxu0 %v4453_v16  ;;  %1960 = vmatprep.subr.bf16.mxu1 %v4456_v18  ;;  %v111_v16 = vpack.c.bf16 %v103_v14, %v103_v14  ;;  %v4546_v18 = vld [vmem:[#allocation4 + $0x14] ss:$8 sps:$4 sm:$0xff]   ;;  %v369_v14 = vld [vmem:[%s5302_s2] sm:$0xf] }
 0x10e   :  { %1826 = vmatprep.mubr.bf16.mxu0 %v112_v21  ;;  %1990 = vmatprep.mubr.bf16.mxu1 %v112_v21  ;;  %v4547_v21 = vld [vmem:[#allocation4 + $0x20] ss:$8 sps:$4 sm:$0xff]  }
 0x110   :  { %1797 = vmatpush1.bf16.msra.mxu0 %v4451_v19  ;;  %1961 = vmatpush1.bf16.msra.mxu1 %v4454_v20  ;;  %v4544_v19 = vld [vmem:[#allocation4 + $0x10] ss:$8 sps:$4 sm:$0xff]   ;;  %v4549_v20 = vld [vmem:[#allocation4 + $0x24] ss:$8 sps:$4 sm:$0xff]  }
 0x111   :  { %1798 = vmatprep.subr.bf16.mxu0 %v4459_v22  ;;  %1962 = vmatprep.subr.bf16.mxu1 %v4462_v23  ;;  %v4552_v22 = vld [vmem:[#allocation4 + $0x34] ss:$8 sps:$4 sm:$0xff]   ;;  %v4550_v23 = vld [vmem:[#allocation4 + $0x30] ss:$8 sps:$4 sm:$0xff]  }
 0x114   :  { %1799 = vmatpush1.bf16.msra.mxu0 %v4457_v24  ;;  %1963 = vmatpush1.bf16.msra.mxu1 %v4460_v25  ;;  %v4555_v24 = vld [vmem:[#allocation4 + $0x44] ss:$8 sps:$4 sm:$0xff]   ;;  %v4553_v25 = vld [vmem:[#allocation4 + $0x40] ss:$8 sps:$4 sm:$0xff]  }
 0x115   :  { %1800 = vmatprep.subr.bf16.mxu0 %v4465_v26  ;;  %1964 = vmatprep.subr.bf16.mxu1 %v4468_v27  ;;  %v4558_v26 = vld [vmem:[#allocation4 + $0x54] ss:$8 sps:$4 sm:$0xff]   ;;  %v4556_v27 = vld [vmem:[#allocation4 + $0x50] ss:$8 sps:$4 sm:$0xff]  }
 0x118   :  { %1801 = vmatpush1.bf16.msra.mxu0 %v4463_v28  ;;  %1965 = vmatpush1.bf16.msra.mxu1 %v4466_v29  ;;  %v4561_v28 = vld [vmem:[#allocation4 + $0x64] ss:$8 sps:$4 sm:$0xff]   ;;  %v4559_v29 = vld [vmem:[#allocation4 + $0x60] ss:$8 sps:$4 sm:$0xff]  }
 0x119   :  { %1802 = vmatprep.subr.bf16.mxu0 %v4471_v30  ;;  %1966 = vmatprep.subr.bf16.mxu1 %v4474_v31  ;;  %v4564_v30 = vld [vmem:[#allocation4 + $0x74] ss:$8 sps:$4 sm:$0xff]   ;;  %v4562_v31 = vld [vmem:[#allocation4 + $0x70] ss:$8 sps:$4 sm:$0xff]  }
 0x11c   :  { %1803 = vmatpush1.bf16.msra.mxu0 %v4469_v32  ;;  %1967 = vmatpush1.bf16.msra.mxu1 %v4472_v33  ;;  %v4567_v32 = vld [vmem:[#allocation4 + $0x84] ss:$8 sps:$4 sm:$0xff]   ;;  %v4565_v33 = vld [vmem:[#allocation4 + $0x80] ss:$8 sps:$4 sm:$0xff]  }
 0x11d   :  { %1804 = vmatprep.subr.bf16.mxu0 %v4477_v34  ;;  %1968 = vmatprep.subr.bf16.mxu1 %v4480_v35  ;;  %v4570_v34 = vld [vmem:[#allocation4 + $0x94] ss:$8 sps:$4 sm:$0xff]   ;;  %v4568_v35 = vld [vmem:[#allocation4 + $0x90] ss:$8 sps:$4 sm:$0xff]  }
 0x120   :  { %1805 = vmatpush1.bf16.msra.mxu0 %v4475_v36  ;;  %1969 = vmatpush1.bf16.msra.mxu1 %v4478_v37  ;;  %v4573_v36 = vld [vmem:[#allocation4 + $0xa4] ss:$8 sps:$4 sm:$0xff]   ;;  %v4571_v37 = vld [vmem:[#allocation4 + $0xa0] ss:$8 sps:$4 sm:$0xff]  }
 0x121   :  { %1806 = vmatprep.subr.bf16.mxu0 %v4483_v38  ;;  %1970 = vmatprep.subr.bf16.mxu1 %v4486_v39  ;;  %v4576_v38 = vld [vmem:[#allocation4 + $0xb4] ss:$8 sps:$4 sm:$0xff]   ;;  %v4574_v39 = vld [vmem:[#allocation4 + $0xb0] ss:$8 sps:$4 sm:$0xff]  }
 0x124   :  { %1807 = vmatpush1.bf16.msra.mxu0 %v4481_v40  ;;  %1971 = vmatpush1.bf16.msra.mxu1 %v4484_v41  ;;  %v4579_v40 = vld [vmem:[#allocation4 + $0xc4] ss:$8 sps:$4 sm:$0xff]   ;;  %v4577_v41 = vld [vmem:[#allocation4 + $0xc0] ss:$8 sps:$4 sm:$0xff]  }
 0x125   :  { %1808 = vmatprep.subr.bf16.mxu0 %v4489_v42  ;;  %1972 = vmatprep.subr.bf16.mxu1 %v4492_v43  ;;  %v4582_v42 = vld [vmem:[#allocation4 + $0xd4] ss:$8 sps:$4 sm:$0xff]   ;;  %v4580_v43 = vld [vmem:[#allocation4 + $0xd0] ss:$8 sps:$4 sm:$0xff]  }
 0x128   :  { %1809 = vmatpush1.bf16.msra.mxu0 %v4487_v44  ;;  %1973 = vmatpush1.bf16.msra.mxu1 %v4490_v45  ;;  %v4585_v44 = vld [vmem:[#allocation4 + $0xe4] ss:$8 sps:$4 sm:$0xff]   ;;  %v4583_v45 = vld [vmem:[#allocation4 + $0xe0] ss:$8 sps:$4 sm:$0xff]  }
 0x129   :  { %1810 = vmatprep.subr.bf16.mxu0 %v4495_v46  ;;  %1974 = vmatprep.subr.bf16.mxu1 %v4498_v47  ;;  %v4588_v46 = vld [vmem:[#allocation4 + $0xf4] ss:$8 sps:$4 sm:$0xff]   ;;  %v4586_v47 = vld [vmem:[#allocation4 + $0xf0] ss:$8 sps:$4 sm:$0xff]  }
 0x12c   :  { %1811 = vmatpush1.bf16.msra.mxu0 %v4493_v48  ;;  %1975 = vmatpush1.bf16.msra.mxu1 %v4496_v49  ;;  %v4591_v48 = vld [vmem:[#allocation4 + $0x104] ss:$8 sps:$4 sm:$0xff]  }
 0x12d   :  { %1812 = vmatprep.subr.bf16.mxu0 %v4501_v50  ;;  %1976 = vmatprep.subr.bf16.mxu1 %v4504_v51  ;;  %v4969_v49 = vld [vmem:[%s5305_s5 + $0x4] ss:$8 sps:$4 sm:$0xff]   ;;  %v4974_v50 = vld [vmem:[%s5305_s5] ss:$8 sps:$4 sm:$0xff]   ;;  %v4979_v51 = vld [vmem:[%s5305_s5 + $0x14] ss:$8 sps:$4 sm:$0xff]  }
 0x130   :  { %1813 = vmatpush1.bf16.msra.mxu0 %v4499_v52  ;;  %1977 = vmatpush1.bf16.msra.mxu1 %v4502_v53  ;;  %v4986_v52 = vld [vmem:[%s5305_s5 + $0x10] ss:$8 sps:$4 sm:$0xff]   ;;  %v4992_v53 = vld [vmem:[%s5305_s5 + $0x24] ss:$8 sps:$4 sm:$0xff]  }
 0x131   :  { %1814 = vmatprep.subr.bf16.mxu0 %v4507_v54  ;;  %1978 = vmatprep.subr.bf16.mxu1 %v4510_v55  ;;  %v4998_v54 = vld [vmem:[%s5305_s5 + $0x20] ss:$8 sps:$4 sm:$0xff]   ;;  %v5004_v55 = vld [vmem:[%s5305_s5 + $0x34] ss:$8 sps:$4 sm:$0xff]  }
 0x134   :  { %1815 = vmatpush1.bf16.msra.mxu0 %v4505_v56  ;;  %1979 = vmatpush1.bf16.msra.mxu1 %v4508_v57  ;;  %v5010_v56 = vld [vmem:[%s5305_s5 + $0x30] ss:$8 sps:$4 sm:$0xff]   ;;  %v5016_v57 = vld [vmem:[%s5305_s5 + $0x44] ss:$8 sps:$4 sm:$0xff]  }
 0x135   :  { %1816 = vmatprep.subr.bf16.mxu0 %v4513_v58  ;;  %1980 = vmatprep.subr.bf16.mxu1 %v4516_v59  ;;  %v5022_v58 = vld [vmem:[%s5305_s5 + $0x40] ss:$8 sps:$4 sm:$0xff]   ;;  %v5028_v59 = vld [vmem:[%s5305_s5 + $0x54] ss:$8 sps:$4 sm:$0xff]  }
 0x138   :  { %1817 = vmatpush1.bf16.msra.mxu0 %v4511_v60  ;;  %1981 = vmatpush1.bf16.msra.mxu1 %v4514_v61  ;;  %v5034_v60 = vld [vmem:[%s5305_s5 + $0x50] ss:$8 sps:$4 sm:$0xff]   ;;  %v5040_v61 = vld [vmem:[%s5305_s5 + $0x64] ss:$8 sps:$4 sm:$0xff]  }
 0x139   :  { %1818 = vmatprep.subr.bf16.mxu0 %v4519_v62  ;;  %1982 = vmatprep.subr.bf16.mxu1 %v4522_v63  ;;  %v5046_v62 = vld [vmem:[%s5305_s5 + $0x60] ss:$8 sps:$4 sm:$0xff]   ;;  %v5052_v63 = vld [vmem:[%s5305_s5 + $0x74] ss:$8 sps:$4 sm:$0xff]  }
 0x13c   :  { %1819 = vmatpush1.bf16.msra.mxu0 %v4517_v0  ;;  %1983 = vmatpush1.bf16.msra.mxu1 %v4520_v1  ;;  %v5058_v0 = vld [vmem:[%s5305_s5 + $0x70] ss:$8 sps:$4 sm:$0xff]   ;;  %v5064_v1 = vld [vmem:[%s5305_s5 + $0x84] ss:$8 sps:$4 sm:$0xff]  }
 0x13d   :  { %1820 = vmatprep.subr.bf16.mxu0 %v4525_v2  ;;  %1984 = vmatprep.subr.bf16.mxu1 %v4528_v3  ;;  %v5070_v2 = vld [vmem:[%s5305_s5 + $0x80] ss:$8 sps:$4 sm:$0xff]   ;;  %v5076_v3 = vld [vmem:[%s5305_s5 + $0x94] ss:$8 sps:$4 sm:$0xff]  }
 0x140   :  { %1821 = vmatpush1.bf16.msra.mxu0 %v4523_v4  ;;  %1985 = vmatpush1.bf16.msra.mxu1 %v4526_v5  ;;  %v5082_v4 = vld [vmem:[%s5305_s5 + $0x90] ss:$8 sps:$4 sm:$0xff]   ;;  %v5088_v5 = vld [vmem:[%s5305_s5 + $0xa4] ss:$8 sps:$4 sm:$0xff]  }
 0x141   :  { %1822 = vmatprep.subr.bf16.mxu0 %v4531_v6  ;;  %1986 = vmatprep.subr.bf16.mxu1 %v4534_v7  ;;  %v371_v6 = vlaneseq  ;;  %v5094_v7 = vld [vmem:[%s5305_s5 + $0xa0] ss:$8 sps:$4 sm:$0xff]  }
 0x144   :  { %1823 = vmatpush1.bf16.msra.mxu0 %v4529_v8  ;;  %1987 = vmatpush1.bf16.msra.mxu1 %v4532_v9  ;;  %v5100_v8 = vld [vmem:[%s5305_s5 + $0xb4] ss:$8 sps:$4 sm:$0xff]   ;;  %v5102_v9 = vshrl.u32 %v371_v6, 7  ;;  %v4592_v6 = vld [vmem:[#allocation4 + $0x110] ss:$8 sps:$4 sm:$0xff]  }
 0x145   :  { %1824 = vmatprep.subr.bf16.mxu0 %v4537_v10  ;;  %1988 = vmatprep.subr.bf16.mxu1 %v4540_v11  ;;  %v5108_v10 = vld [vmem:[%s5305_s5 + $0xb0] ss:$8 sps:$4 sm:$0xff]   ;;  %v5114_v11 = vld [vmem:[%s5305_s5 + $0xc4] ss:$8 sps:$4 sm:$0xff]  }
 0x148   :  { %1825 = vmatpush1.bf16.msra.mxu0 %v4535_v12  ;;  %1989 = vmatpush1.bf16.msra.mxu1 %v4538_v13  ;;  %v373_v12 = vsub.s32 0, %v5102_v9  ;;  %v381_v13 = vsub.s32 2, %v5102_v9 }
 0x149   :  { %2507 = vmatprep.subr.bf16.mxu0 %v4543_v15  ;;  %3847 = vmatprep.subr.bf16.mxu1 %v4969_v49  ;;  %v377_v15 = vsub.s32 1, %v5102_v9 }
 0x14b   :  { %1827 = vmatmul.mubr.bf16.vlgmr.msra.gmra.mrb[0].mxu0 %v111_v16  ;;  %1991 = vmatmul.mubr.bf16.vlgmr.msra.gmra.mrb[0].mxu1 %v111_v16  ;;  %v385_v16 = vsub.s32 3, %v5102_v9 }
 0x14c   :  { %2508 = vmatpush1.bf16.msra.mxu0 %v4541_v17  ;;  %3849 = vmatpush1.bf16.msra.mxu1 %v4974_v50  ;;  %v5127_v17 = vld [vmem:[%s5305_s5 + $0xc0] ss:$8 sps:$4 sm:$0xff]  }
 0x14d   :  { %2509 = vmatprep.subr.bf16.mxu0 %v4546_v18  ;;  %3851 = vmatprep.subr.bf16.mxu1 %v4979_v51  ;;  %v5133_v18 = vld [vmem:[%s5305_s5 + $0xd4] ss:$8 sps:$4 sm:$0xff]  }
 0x150   :  { %2510 = vmatpush1.bf16.msra.mxu0 %v4544_v19  ;;  %3853 = vmatpush1.bf16.msra.mxu1 %v4986_v52  ;;  %v374_v19 = vrot.slane %v369_v14, %v373_v12 }
 0x151   :  { %2511 = vmatprep.subr.bf16.mxu0 %v4549_v20  ;;  %3855 = vmatprep.subr.bf16.mxu1 %v4992_v53  ;;  %v382_v20 = vrot.slane %v369_v14, %v381_v13  ;;  %v4597_v13 = vld [vmem:[#allocation4 + $0x124] ss:$8 sps:$4 sm:$0xff]  }
 0x154   :  { %2512 = vmatpush1.bf16.msra.mxu0 %v4547_v21  ;;  %3857 = vmatpush1.bf16.msra.mxu1 %v4998_v54  ;;  %v378_v21 = vrot.slane %v369_v14, %v377_v15 }
 0x155   :  { %2513 = vmatprep.subr.bf16.mxu0 %v4552_v22  ;;  %3859 = vmatprep.subr.bf16.mxu1 %v5004_v55  ;;  %v386_v22 = vrot.slane %v369_v14, %v385_v16  ;;  %v4595_v14 = vld [vmem:[#allocation4 + $0x120] ss:$8 sps:$4 sm:$0xff]   ;;  %v4600_v16 = vld [vmem:[#allocation4 + $0x134] ss:$8 sps:$4 sm:$0xff]  }
 0x158   :  { %2514 = vmatpush1.bf16.msra.mxu0 %v4550_v23  ;;  %3861 = vmatpush1.bf16.msra.mxu1 %v5010_v56  ;;  %v5143_v23 = vld [vmem:[%s5305_s5 + $0xd0] ss:$8 sps:$4 sm:$0xff]  }
 0x159   :  { %2515 = vmatprep.subr.bf16.mxu0 %v4555_v24  ;;  %3863 = vmatprep.subr.bf16.mxu1 %v5016_v57 }
 0x15c   :  { %2516 = vmatpush1.bf16.msra.mxu0 %v4553_v25  ;;  %3865 = vmatpush1.bf16.msra.mxu1 %v5022_v58 }
 0x15d   :  { %2517 = vmatprep.subr.bf16.mxu0 %v4558_v26  ;;  %3867 = vmatprep.subr.bf16.mxu1 %v5028_v59 }
 0x160   :  { %2518 = vmatpush1.bf16.msra.mxu0 %v4556_v27  ;;  %3869 = vmatpush1.bf16.msra.mxu1 %v5034_v60 }
 0x161   :  { %2519 = vmatprep.subr.bf16.mxu0 %v4561_v28  ;;  %3871 = vmatprep.subr.bf16.mxu1 %v5040_v61 }
 0x164   :  { %2520 = vmatpush1.bf16.msra.mxu0 %v4559_v29  ;;  %3873 = vmatpush1.bf16.msra.mxu1 %v5046_v62 }
 0x165   :  { %2521 = vmatprep.subr.bf16.mxu0 %v4564_v30  ;;  %3875 = vmatprep.subr.bf16.mxu1 %v5052_v63 }
 0x168   :  { %2522 = vmatpush1.bf16.msra.mxu0 %v4562_v31  ;;  %3877 = vmatpush1.bf16.msra.mxu1 %v5058_v0 }
 0x169   :  { %2523 = vmatprep.subr.bf16.mxu0 %v4567_v32  ;;  %3879 = vmatprep.subr.bf16.mxu1 %v5064_v1 }
 0x16c   :  { %2524 = vmatpush1.bf16.msra.mxu0 %v4565_v33  ;;  %3881 = vmatpush1.bf16.msra.mxu1 %v5070_v2 }
 0x16d   :  { %2525 = vmatprep.subr.bf16.mxu0 %v4570_v34  ;;  %3883 = vmatprep.subr.bf16.mxu1 %v5076_v3 }
 0x170   :  { %2526 = vmatpush1.bf16.msra.mxu0 %v4568_v35  ;;  %3885 = vmatpush1.bf16.msra.mxu1 %v5082_v4 }
 0x171   :  { %2527 = vmatprep.subr.bf16.mxu0 %v4573_v36  ;;  %3887 = vmatprep.subr.bf16.mxu1 %v5088_v5 }
 0x174   :  { %2528 = vmatpush1.bf16.msra.mxu0 %v4571_v37  ;;  %3889 = vmatpush1.bf16.msra.mxu1 %v5094_v7 }
 0x175   :  { %2529 = vmatprep.subr.bf16.mxu0 %v4576_v38  ;;  %3891 = vmatprep.subr.bf16.mxu1 %v5100_v8 }
 0x178   :  { %2530 = vmatpush1.bf16.msra.mxu0 %v4574_v39  ;;  %3893 = vmatpush1.bf16.msra.mxu1 %v5108_v10 }
 0x179   :  { %2531 = vmatprep.subr.bf16.mxu0 %v4579_v40  ;;  %3895 = vmatprep.subr.bf16.mxu1 %v5114_v11 }
 0x17c   :  { %2532 = vmatpush1.bf16.msra.mxu0 %v4577_v41  ;;  %3897 = vmatpush1.bf16.msra.mxu1 %v5127_v17 }
 0x17d   :  { %2533 = vmatprep.subr.bf16.mxu0 %v4582_v42  ;;  %3899 = vmatprep.subr.bf16.mxu1 %v5133_v18 }
 0x180   :  { %2534 = vmatpush1.bf16.msra.mxu0 %v4580_v43  ;;  %3901 = vmatpush1.bf16.msra.mxu1 %v5143_v23 }
 0x181   :  { %2535 = vmatprep.subr.bf16.mxu0 %v4585_v44 }
 0x184   :  { %2536 = vmatpush1.bf16.msra.mxu0 %v4583_v45  ;;  %v4589_v45 = vld [vmem:[#allocation4 + $0x100] ss:$8 sps:$4 sm:$0xff]  }
 0x185   :  { %2537 = vmatprep.subr.bf16.mxu0 %v4588_v46 }
 0x188   :  { %2538 = vmatpush1.bf16.msra.mxu0 %v4586_v47  ;;  %v4594_v47 = vld [vmem:[#allocation4 + $0x114] ss:$8 sps:$4 sm:$0xff]  }
 0x189   :  { %2548 = vmatprep.subr.bf16.mxu0 %v4591_v48 }
 0x21e   :  { %v1828_v24 = vpop.f32.mrb[0].mxu0  ;;  %v1992_v25 = vpop.f32.mrb[0].mxu1 }
 0x21f   :  { %v4046_v26 = vadd.f32 %v1828_v24, %v374_v19  ;;  %v4048_v27 = vadd.f32 %v1992_v25, %v382_v20  ;;  %v1830_v28 = vpop.f32.mrb[1].mxu0  ;;  %v1994_v29 = vpop.f32.mrb[1].mxu1  ;;  %v4598_v19 = vld [vmem:[#allocation4 + $0x130] ss:$8 sps:$4 sm:$0xff]   ;;  %v4603_v20 = vld [vmem:[#allocation4 + $0x144] ss:$8 sps:$4 sm:$0xff]  }
 0x220   :  { %v4047_v30 = vadd.f32 %v1830_v28, %v378_v21  ;;  %v4049_v31 = vadd.f32 %v1994_v29, %v386_v22  ;;  %v1832_v32 = vpop.f32.mrb[2].mxu0  ;;  %v1996_v33 = vpop.f32.mrb[2].mxu1  ;;  %v4601_v21 = vld [vmem:[#allocation4 + $0x140] ss:$8 sps:$4 sm:$0xff]   ;;  %v4606_v22 = vld [vmem:[#allocation4 + $0x154] ss:$8 sps:$4 sm:$0xff]  }
 0x221   :  { %v1999_v34 = vmul.f32 0.2, %v4046_v26  ;;  %v2001_v35 = vmul.f32 0.2, %v4048_v27  ;;  %v1833_v36 = vpop.f32.mrb[3].mxu0  ;;  %v1997_v37 = vpop.f32.mrb[3].mxu1 }
 0x222   :  { %v2000_v38 = vmul.f32 0.2, %v4047_v30  ;;  %v2002_v39 = vmul.f32 0.2, %v4049_v31  ;;  %v4604_v24 = vld [vmem:[#allocation4 + $0x150] ss:$8 sps:$4 sm:$0xff]  }
 0x223   :  { %v2003_v40 = vmax.f32 %v4046_v26, %v1999_v34  ;;  %v5147_v41 = vmax.f32 %v4048_v27, %v2001_v35  ;;  %v4609_v25 = vld [vmem:[#allocation4 + $0x164] ss:$8 sps:$4 sm:$0xff]   ;;  %v4607_v26 = vld [vmem:[#allocation4 + $0x160] ss:$8 sps:$4 sm:$0xff]   ;;  %v4612_v27 = vld [vmem:[#allocation4 + $0x174] ss:$8 sps:$4 sm:$0xff]  }
 0x224   :  { %v2004_v42 = vmax.f32 %v4047_v30, %v2000_v38  ;;  %v2006_v43 = vmax.f32 %v4049_v31, %v2002_v39  ;;  %v4610_v28 = vld [vmem:[#allocation4 + $0x170] ss:$8 sps:$4 sm:$0xff]   ;;  %v4615_v29 = vld [vmem:[#allocation4 + $0x184] ss:$8 sps:$4 sm:$0xff]   ;;  %v4613_v30 = vld [vmem:[#allocation4 + $0x180] ss:$8 sps:$4 sm:$0xff]  }
 0x225   :  { %2007 = vst [vmem:[%s5310_s10] sm:$0xff] %v2003_v40  ;;  %2009 = vst [vmem:[%s5310_s10 + $0x10] sm:$0xff] %v5147_v41  ;;  %v2172_v46 = vpack.c.bf16 %v2003_v40, %v2003_v40  ;;  %v4618_v31 = vld [vmem:[#allocation4 + $0x194] ss:$8 sps:$4 sm:$0xff]   ;;  %v4616_v32 = vld [vmem:[#allocation4 + $0x190] ss:$8 sps:$4 sm:$0xff]  }
 0x226   :  { %2008 = vst [vmem:[%s5310_s10 + $0x8] sm:$0xff] %v2004_v42  ;;  %2010 = vst [vmem:[%s5310_s10 + $0x18] sm:$0xff] %v2006_v43  ;;  %v2173_v44 = vpack.c.bf16 %v2004_v42, %v2004_v42  ;;  %v2175_v48 = vpack.c.bf16 %v2006_v43, %v2006_v43  ;;  %v4621_v33 = vld [vmem:[#allocation4 + $0x1a4] ss:$8 sps:$4 sm:$0xff]   ;;  %v4619_v34 = vld [vmem:[#allocation4 + $0x1a0] ss:$8 sps:$4 sm:$0xff]  }
 0x227   :  { %v4624_v35 = vld [vmem:[#allocation4 + $0x1b4] ss:$8 sps:$4 sm:$0xff]   ;;  %v4622_v36 = vld [vmem:[#allocation4 + $0x1b0] ss:$8 sps:$4 sm:$0xff]   ;;  %v4627_v37 = vld [vmem:[#allocation4 + $0x1c4] ss:$8 sps:$4 sm:$0xff]  }
 0x228   :  { %2539 = vmatprep.mubr.bf16.mxu0 %v2173_v44  ;;  %v4625_v38 = vld [vmem:[#allocation4 + $0x1c0] ss:$8 sps:$4 sm:$0xff]   ;;  %v4630_v39 = vld [vmem:[#allocation4 + $0x1d4] ss:$8 sps:$4 sm:$0xff]   ;;  %v4628_v40 = vld [vmem:[#allocation4 + $0x1d0] ss:$8 sps:$4 sm:$0xff]  }
 0x229   :  { %2540 = vmatmul.mubr.bf16.vlgmr.msra.gmra.mrb[4].mxu0 %v2172_v46  ;;  %v4633_v42 = vld [vmem:[#allocation4 + $0x1e4] ss:$8 sps:$4 sm:$0xff]   ;;  %v4631_v43 = vld [vmem:[#allocation4 + $0x1e0] ss:$8 sps:$4 sm:$0xff]   ;;  %v4636_v44 = vld [vmem:[#allocation4 + $0x1f4] ss:$8 sps:$4 sm:$0xff]   ;;  %v2174_v46 = vpack.c.bf16 %v5147_v41, %v5147_v41 }
 0x22a   :  { %2549 = vmatpush1.bf16.msra.mxu0 %v4589_v45  ;;  %2580 = vmatprep.mubr.bf16.mxu0 %v2175_v48  ;;  %v4634_v45 = vld [vmem:[#allocation4 + $0x1f0] ss:$8 sps:$4 sm:$0xff]   ;;  %v4681_v48 = vld [vmem:[%s5305_s5 + $0xe0] ss:$8 sps:$4 sm:$0xff]  }
 0x22b   :  { %2550 = vmatprep.subr.bf16.mxu0 %v4594_v47  ;;  %v4679_v47 = vld [vmem:[%s5305_s5 + $0xe4] ss:$8 sps:$4 sm:$0xff]   ;;  %v2075_v41 = vld [vmem:[%s5304_s4] sm:$0x3] }
 0x22c   :  { %3903 = vmatprep.subr.bf16.mxu1 %v4679_v47 }
 0x22d   :  { %3905 = vmatpush1.bf16.msra.mxu1 %v4681_v48 }
 0x22e   :  { %2551 = vmatpush1.bf16.msra.mxu0 %v4592_v6  ;;  %v4682_v6 = vld [vmem:[%s5305_s5 + $0xf4] ss:$8 sps:$4 sm:$0xff]  }
 0x22f   :  { %2552 = vmatprep.subr.bf16.mxu0 %v4597_v13  ;;  %v4684_v13 = vld [vmem:[%s5305_s5 + $0xf0] ss:$8 sps:$4 sm:$0xff]   ;;  %3907 = vmatprep.subr.bf16.mxu1 %v4682_v6 }
 0x231   :  { %3909 = vmatpush1.bf16.msra.mxu1 %v4684_v13 }
 0x232   :  { %2553 = vmatpush1.bf16.msra.mxu0 %v4595_v14  ;;  %3911 = vmatprep.subr.bf16.mxu1 %v4969_v49  ;;  %v2180_v14 = vrot.slane %v2075_v41, %v373_v12 }
 0x233   :  { %2554 = vmatprep.subr.bf16.mxu0 %v4600_v16  ;;  %v2184_v16 = vrot.slane %v2075_v41, %v377_v15  ;;  %v4813_v41 = vmov 0.0  }
 0x236   :  { %2555 = vmatpush1.bf16.msra.mxu0 %v4598_v19 }
 0x237   :  { %2556 = vmatprep.subr.bf16.mxu0 %v4603_v20 }
 0x23a   :  { %2557 = vmatpush1.bf16.msra.mxu0 %v4601_v21 }
 0x23b   :  { %2558 = vmatprep.subr.bf16.mxu0 %v4606_v22 }
 0x23e   :  { %2559 = vmatpush1.bf16.msra.mxu0 %v4604_v24 }
 0x23f   :  { %2560 = vmatprep.subr.bf16.mxu0 %v4609_v25 }
 0x242   :  { %2561 = vmatpush1.bf16.msra.mxu0 %v4607_v26 }
 0x243   :  { %2562 = vmatprep.subr.bf16.mxu0 %v4612_v27 }
 0x246   :  { %2563 = vmatpush1.bf16.msra.mxu0 %v4610_v28 }
 0x247   :  { %2564 = vmatprep.subr.bf16.mxu0 %v4615_v29 }
 0x24a   :  { %2565 = vmatpush1.bf16.msra.mxu0 %v4613_v30 }
 0x24b   :  { %2566 = vmatprep.subr.bf16.mxu0 %v4618_v31 }
 0x24e   :  { %2567 = vmatpush1.bf16.msra.mxu0 %v4616_v32 }
 0x24f   :  { %2568 = vmatprep.subr.bf16.mxu0 %v4621_v33 }
 0x252   :  { %2569 = vmatpush1.bf16.msra.mxu0 %v4619_v34 }
 0x253   :  { %2570 = vmatprep.subr.bf16.mxu0 %v4624_v35 }
 0x256   :  { %2571 = vmatpush1.bf16.msra.mxu0 %v4622_v36 }
 0x257   :  { %2572 = vmatprep.subr.bf16.mxu0 %v4627_v37 }
 0x25a   :  { %2573 = vmatpush1.bf16.msra.mxu0 %v4625_v38 }
 0x25b   :  { %2574 = vmatprep.subr.bf16.mxu0 %v4630_v39 }
 0x25e   :  { %2575 = vmatpush1.bf16.msra.mxu0 %v4628_v40 }
 0x25f   :  { %2576 = vmatprep.subr.bf16.mxu0 %v4633_v42 }
 0x262   :  { %2577 = vmatpush1.bf16.msra.mxu0 %v4631_v43 }
 0x263   :  { %2578 = vmatprep.subr.bf16.mxu0 %v4636_v44 }
 0x266   :  { %2579 = vmatpush1.bf16.msra.mxu0 %v4634_v45 }
 0x269   :  { %2581 = vmatmul.mubr.bf16.vlgmr.msra.gmra.mrb[4].mxu0 %v2174_v46 }
 0x33c   :  { %v2582_v19 = vpop.f32.mrb[4].mxu0 }
 0x33d   :  { %v4050_v20 = vadd.f32 %v2582_v19, %v2180_v14  ;;  %v2584_v21 = vpop.f32.mrb[5].mxu0 }
 0x33e   :  { %v4051_v22 = vadd.f32 %v2584_v21, %v2184_v16  ;;  %v2586_v24 = vpop.f32.mrb[6].mxu0  ;;  %v3573_v16 = vld [vmem:[%s5307_s7] ss:$0 sm:$0xff] }
 0x33f   :  { %v2589_v25 = vmul.f32 0.2, %v4050_v20  ;;  %v2587_v26 = vpop.f32.mrb[7].mxu0 }
 0x340   :  { %v2590_v27 = vmul.f32 0.2, %v4051_v22 }
 0x341   :  { %v5184_v28 = vmax.f32 %v4050_v20, %v2589_v25 }
 0x342   :  { %v5186_v49 = vmax.f32 %v4051_v22, %v2590_v27  ;;  %v3623_v27 = vld [vmem:[%s5309_s9] sm:$0xff]  }
 0x343   :  { %2593 = vst [vmem:[%s5311_s11] sm:$0xff] %v5184_v28 }
 0x344   :  { %2594 = vst [vmem:[%s5311_s11 + $0x8] sm:$0xff] %v5186_v49  ;;  %2659 = vmatprep.mubr.f32.mxu1 %v5186_v49  ;;  %v2667_v9 = vmul.f32 %v5186_v49, %v5186_v49 }
 0x345   :  { %2660 = vmatmul.mubr.f32.vlgmr.msra.gmra.mrb[4].mxu1 %v5184_v28 }
 0x346   :  { %3913 = vmatpush1.bf16.msra.mxu1 %v4974_v50  ;;  %2732 = vmatprep.mubr.f32.mxu1 %v2667_v9  ;;  %v2666_v50 = vmul.f32 %v5184_v28, %v5184_v28  ;;  %v3662_v9 = vld [vmem:[%s5309_s9 + $0x10] sm:$0xff]  }
 0x347   :  { %3915 = vmatprep.subr.bf16.mxu1 %v4979_v51  ;;  %v4685_v51 = vld [vmem:[#allocation6 + $0x40] sm:$0xff]  }
 0x348   :  { %3668 = vmatprep.subr.bf16.mxu0 %v4685_v51  ;;  %v3664_v51 = vld [vmem:[%s5309_s9 + $0x20] sm:$0xff]  }
 0x34a   :  { %3917 = vmatpush1.bf16.msra.mxu1 %v4986_v52  ;;  %v4686_v52 = vld [vmem:[#allocation6] sm:$0xff]  }
 0x34b   :  { %3919 = vmatprep.subr.bf16.mxu1 %v4992_v53  ;;  %3669 = vmatpush3.bf16.msra.mxu0 %v4686_v52  ;;  %v4687_v53 = vld [vmem:[#allocation6 + $0x48] sm:$0xff]  }
 0x34c   :  { %3670 = vmatprep.subr.bf16.mxu0 %v4687_v53  ;;  %v3665_v52 = vld [vmem:[%s5309_s9 + $0x28] sm:$0xff]   ;;  %v3666_v53 = vld [vmem:[%s5309_s9 + $0x30] sm:$0xff]  }
 0x34e   :  { %3921 = vmatpush1.bf16.msra.mxu1 %v4998_v54  ;;  %v4688_v54 = vld [vmem:[#allocation6 + $0x8] sm:$0xff]  }
 0x34f   :  { %3923 = vmatprep.subr.bf16.mxu1 %v5004_v55  ;;  %3671 = vmatpush3.bf16.msra.mxu0 %v4688_v54  ;;  %v4689_v55 = vld [vmem:[#allocation6 + $0x50] sm:$0xff]   ;;  %v3667_v54 = vld [vmem:[%s5309_s9 + $0x38] sm:$0xff]  }
 0x350   :  { %3672 = vmatprep.subr.bf16.mxu0 %v4689_v55 }
 0x352   :  { %3925 = vmatpush1.bf16.msra.mxu1 %v5010_v56  ;;  %v4690_v56 = vld [vmem:[#allocation6 + $0x10] sm:$0xff]  }
 0x353   :  { %3927 = vmatprep.subr.bf16.mxu1 %v5016_v57  ;;  %3673 = vmatpush3.bf16.msra.mxu0 %v4690_v56  ;;  %v4691_v57 = vld [vmem:[#allocation6 + $0x58] sm:$0xff]  }
 0x354   :  { %3674 = vmatprep.subr.bf16.mxu0 %v4691_v57 }
 0x356   :  { %3929 = vmatpush1.bf16.msra.mxu1 %v5022_v58  ;;  %v4692_v58 = vld [vmem:[#allocation6 + $0x18] sm:$0xff]  }
 0x357   :  { %3931 = vmatprep.subr.bf16.mxu1 %v5028_v59  ;;  %v4693_v59 = vld [vmem:[#allocation6 + $0x60] sm:$0xff]   ;;  %3675 = vmatpush3.bf16.msra.mxu0 %v4692_v58 }
 0x358   :  { %3676 = vmatprep.subr.bf16.mxu0 %v4693_v59 }
 0x35a   :  { %3933 = vmatpush1.bf16.msra.mxu1 %v5034_v60  ;;  %v4694_v60 = vld [vmem:[#allocation6 + $0x20] sm:$0xff]  }
 0x35b   :  { %3935 = vmatprep.subr.bf16.mxu1 %v5040_v61  ;;  %v4695_v61 = vld [vmem:[#allocation6 + $0x68] sm:$0xff]   ;;  %3677 = vmatpush3.bf16.msra.mxu0 %v4694_v60 }
 0x35c   :  { %3678 = vmatprep.subr.bf16.mxu0 %v4695_v61 }
 0x35e   :  { %3937 = vmatpush1.bf16.msra.mxu1 %v5046_v62  ;;  %v4696_v62 = vld [vmem:[#allocation6 + $0x28] sm:$0xff]  }
 0x35f   :  { %3939 = vmatprep.subr.bf16.mxu1 %v5052_v63  ;;  %v4697_v63 = vld [vmem:[#allocation6 + $0x70] sm:$0xff]   ;;  %3679 = vmatpush3.bf16.msra.mxu0 %v4696_v62 }
 0x360   :  { %3680 = vmatprep.subr.bf16.mxu0 %v4697_v63 }
 0x362   :  { %3941 = vmatpush1.bf16.msra.mxu1 %v5058_v0  ;;  %v4698_v0 = vld [vmem:[#allocation6 + $0x30] sm:$0xff]  }
 0x363   :  { %3943 = vmatprep.subr.bf16.mxu1 %v5064_v1  ;;  %v4699_v1 = vld [vmem:[#allocation6 + $0x78] sm:$0xff]   ;;  %3681 = vmatpush3.bf16.msra.mxu0 %v4698_v0 }
 0x364   :  { %3682 = vmatprep.subr.bf16.mxu0 %v4699_v1 }
 0x366   :  { %3945 = vmatpush1.bf16.msra.mxu1 %v5070_v2  ;;  %v4700_v2 = vld [vmem:[#allocation6 + $0x38] sm:$0xff]  }
 0x367   :  { %3947 = vmatprep.subr.bf16.mxu1 %v5076_v3  ;;  %3683 = vmatpush3.bf16.msra.mxu0 %v4700_v2  ;;  %v3591_v3 = vld [vmem:[#allocation7] sm:$0xff]  }
 0x36a   :  { %3949 = vmatpush1.bf16.msra.mxu1 %v5082_v4  ;;  %v4811_v4 = vmov 0.0|0.0  }
 0x36b   :  { %3951 = vmatprep.subr.bf16.mxu1 %v5088_v5  ;;  %3998 = vmatprep.subr.bf16.mxu0 %v4811_v4  ;;  %v3654_v5 = vld [vmem:[#allocation7 + $0x8] sm:$0xff]  }
 0x36e   :  { %3953 = vmatpush1.bf16.msra.mxu1 %v5094_v7  ;;  %v3655_v7 = vld [vmem:[#allocation7 + $0x10] sm:$0xff]  }
 0x36f   :  { %3955 = vmatprep.subr.bf16.mxu1 %v5100_v8  ;;  %v3656_v8 = vld [vmem:[#allocation7 + $0x18] sm:$0xff]  }
 0x372   :  { %3957 = vmatpush1.bf16.msra.mxu1 %v5108_v10  ;;  %v3657_v10 = vld [vmem:[#allocation7 + $0x20] sm:$0xff]  }
 0x373   :  { %3959 = vmatprep.subr.bf16.mxu1 %v5114_v11  ;;  %v3658_v11 = vld [vmem:[#allocation7 + $0x28] sm:$0xff]  }
 0x376   :  { %3961 = vmatpush1.bf16.msra.mxu1 %v5127_v17 }
 0x377   :  { %3963 = vmatprep.subr.bf16.mxu1 %v5133_v18 }
 0x37a   :  { %3965 = vmatpush1.bf16.msra.mxu1 %v5143_v23 }
 0x37b   :  { %3967 = vmatprep.subr.bf16.mxu1 %v4679_v47 }
 0x37e   :  { %3969 = vmatpush1.bf16.msra.mxu1 %v4681_v48 }
 0x37f   :  { %3971 = vmatprep.subr.bf16.mxu1 %v4682_v6  ;;  %v3659_v6 = vld [vmem:[#allocation7 + $0x30] sm:$0xff]  }
 0x382   :  { %3973 = vmatpush1.bf16.msra.mxu1 %v4684_v13  ;;  %v3660_v13 = vld [vmem:[#allocation7 + $0x38] sm:$0xff]  }
 0x383   :  { %3974 = vmatprep.subr.bf16.mxu1 %v4811_v4 }
 0x385   :  { %2733 = vmatmul.mubr.f32.vlgmr.msra.gmra.mrb[6].mxu1 %v2666_v50  ;;  %v3663_v50 = vld [vmem:[%s5309_s9 + $0x18] sm:$0xff]  }
 0x386   :  { %3976 = vmatpush3.bf16.msra.mxu1 %v3591_v3  ;;  %3773 = vmatprep.mubr.msk.f32.mxu1 %vm4812_vm0, %v4813_v41 }
 0x387   :  { %3977 = vmatprep.subr.bf16.mxu1 %v4811_v4 }
 0x38a   :  { %3979 = vmatpush3.bf16.msra.mxu1 %v3654_v5 }
 0x38b   :  { %3980 = vmatprep.subr.bf16.mxu1 %v4811_v4 }
 0x38e   :  { %3982 = vmatpush3.bf16.msra.mxu1 %v3655_v7 }
 0x38f   :  { %3983 = vmatprep.subr.bf16.mxu1 %v4811_v4 }
 0x392   :  { %3985 = vmatpush3.bf16.msra.mxu1 %v3656_v8 }
 0x393   :  { %3986 = vmatprep.subr.bf16.mxu1 %v4811_v4 }
 0x396   :  { %3988 = vmatpush3.bf16.msra.mxu1 %v3657_v10 }
 0x397   :  { %3989 = vmatprep.subr.bf16.mxu1 %v4811_v4 }
 0x39a   :  { %3991 = vmatpush3.bf16.msra.mxu1 %v3658_v11 }
 0x39b   :  { %3992 = vmatprep.subr.bf16.mxu1 %v4811_v4 }
 0x39e   :  { %3994 = vmatpush3.bf16.msra.mxu1 %v3659_v6 }
 0x39f   :  { %3995 = vmatprep.subr.bf16.mxu1 %v4811_v4 }
 0x3a2   :  { %3997 = vmatpush3.bf16.msra.mxu1 %v3660_v13 }
 0x3a3   :  { %4022 = vmatprep.subr.bf16.mxu1 %v4811_v4 }
 0x418   :  { %v2661_v12 = vpop.f32.mrb[4].mxu1 }
 0x419   :  { %v2663_v15 = vpop.f32.mrb[5].mxu1  ;;  %v2739_v17 = vmul.f32 %v2661_v12, %v2661_v12  ;;  %v2745_v36 = vsub.f32 %v5184_v28, %v2661_v12 }
 0x41a   :  { %v2740_v18 = vmul.f32 %v2663_v15, %v2663_v15  ;;  %v2746_v38 = vsub.f32 %v5186_v49, %v2663_v15  ;;  %v3661_v49 = vld [vmem:[%s5309_s9 + $0x8] sm:$0xff]  }
 0x458   :  { %v2734_v23 = vpop.f32.mrb[6].mxu1 }
 0x459   :  { %v2741_v29 = vsub.f32 %v2734_v23, %v2739_v17  ;;  %v2736_v30 = vpop.f32.mrb[7].mxu1 }
 0x45a   :  { %v2742_v31 = vsub.f32 %v2736_v30, %v2740_v18 }
 0x45b   :  { %v2743_v32 = vmax.f32 %v2741_v29, 0.0 }
 0x45c   :  { %v2744_v33 = vmax.f32 %v2742_v31, 0.0 }
 0x45d   :  { %v2747_v34 = vadd.f32 1e-06, %v2743_v32 }
 0x45e   :  { %v2748_v35 = vadd.f32 1e-06, %v2744_v33 }
 0x45f   :  { %4701 = vrsqrt.f32 %v2747_v34 }
 0x460   :  { %4703 = vrsqrt.f32 %v2748_v35 }
 0x469   :  { %v4702_v37 = vpop.eup %4701 }
 0x46a   :  { %v4704_v39 = vpop.eup %4703  ;;  %v2751_v40 = vmul.f32 %v4702_v37, %v2745_v36 }
 0x46b   :  { %v2752_v42 = vmul.f32 %v4704_v39, %v2746_v38 }
 0x46c   :  { %v2753_v43 = vmul.f32 0.2, %v2751_v40 }
 0x46d   :  { %v2754_v44 = vmul.f32 0.2, %v2752_v42 }
 0x46e   :  { %v2755_v45 = vmax.f32 %v2751_v40, %v2753_v43 }
 0x46f   :  { %v2756_v46 = vmax.f32 %v2752_v42, %v2754_v44 }
 0x470   :  { %2757 = vst [vmem:[%s5312_s12] sm:$0xff] %v2755_v45  ;;  %v2824_v48 = vpack.c.bf16 %v2755_v45, %v2755_v45 }
 0x471   :  { %2758 = vst [vmem:[%s5312_s12 + $0x8] sm:$0xff] %v2756_v46  ;;  %v2825_v47 = vpack.c.bf16 %v2756_v46, %v2756_v46 }
 0x473   :  { %2960 = vmatprep.mubr.bf16.mxu0 %v2825_v47 }
 0x474   :  { %2961 = vmatmul.mubr.bf16.vlgmr.msra.gmra.mrb[8].mxu0 %v2824_v48 }
 0x475   :  { %4000 = vmatpush3.bf16.msra.mxu0 %v3591_v3  ;;  %3808 = vmatprep.mubr.msk.f32.mxu0 %vm4812_vm0, %v4813_v41 }
 0x476   :  { %4001 = vmatprep.subr.bf16.mxu0 %v4811_v4 }
 0x479   :  { %4003 = vmatpush3.bf16.msra.mxu0 %v3654_v5 }
 0x47a   :  { %4004 = vmatprep.subr.bf16.mxu0 %v4811_v4 }
 0x47d   :  { %4006 = vmatpush3.bf16.msra.mxu0 %v3655_v7 }
 0x47e   :  { %4007 = vmatprep.subr.bf16.mxu0 %v4811_v4 }
 0x481   :  { %4009 = vmatpush3.bf16.msra.mxu0 %v3656_v8 }
 0x482   :  { %4010 = vmatprep.subr.bf16.mxu0 %v4811_v4 }
 0x485   :  { %4012 = vmatpush3.bf16.msra.mxu0 %v3657_v10 }
 0x486   :  { %4013 = vmatprep.subr.bf16.mxu0 %v4811_v4 }
 0x489   :  { %4015 = vmatpush3.bf16.msra.mxu0 %v3658_v11 }
 0x48a   :  { %4016 = vmatprep.subr.bf16.mxu0 %v4811_v4 }
 0x48d   :  { %4018 = vmatpush3.bf16.msra.mxu0 %v3659_v6 }
 0x48e   :  { %4019 = vmatprep.subr.bf16.mxu0 %v4811_v4 }
 0x491   :  { %4021 = vmatpush3.bf16.msra.mxu0 %v3660_v13 }
 0x547   :  { %v3684_v14 = vpop.f32.mrb[8].mxu0 }
 0x548   :  { %v3685_v19 = vpop.f32.mrb[9].mxu0 }
 0x549   :  { %v3686_v20 = vadd.f32 %v3685_v19, %v3684_v14  ;;  %v3687_v21 = vpop.f32.mrb[10].mxu0 }
 0x54a   :  { %v3688_v22 = vpop.f32.mrb[11].mxu0 }
 0x54b   :  { %v2963_v24 = vadd.f32 %v3686_v20, %v3573_v16 }
 0x54d   :  { %v2968_v25 = vmul.f32 0.2, %v2963_v24 }
 0x54f   :  { %v2969_v26 = vmax.f32 %v2963_v24, %v2968_v25 }
 0x551   :  { %2970 = vst [vmem:[%s5313_s13] sm:$0xff] %v2969_v26  ;;  %3774 = vmatmul.mubr.f32.vlgmr.msra.gmra.mrb[8].mxu1 %v2969_v26  ;;  %v3041_v28 = vmul.f32 %v2969_v26, %v2969_v26 }
 0x552   :  { %4024 = vmatpush3.bf16.msra.mxu1 %v3623_v27  ;;  %3843 = vmatprep.mubr.msk.f32.mxu1 %vm4812_vm0, %v4813_v41 }
 0x553   :  { %3809 = vmatmul.mubr.f32.vlgmr.msra.gmra.mrb[12].mxu0 %v3041_v28  ;;  %4025 = vmatprep.subr.bf16.mxu1 %v4811_v4 }
 0x556   :  { %4027 = vmatpush3.bf16.msra.mxu1 %v3661_v49 }
 0x557   :  { %4028 = vmatprep.subr.bf16.mxu1 %v4811_v4 }
 0x55a   :  { %4030 = vmatpush3.bf16.msra.mxu1 %v3662_v9 }
 0x55b   :  { %4031 = vmatprep.subr.bf16.mxu1 %v4811_v4 }
 0x55e   :  { %4033 = vmatpush3.bf16.msra.mxu1 %v3663_v50 }
 0x55f   :  { %4034 = vmatprep.subr.bf16.mxu1 %v4811_v4 }
 0x562   :  { %4036 = vmatpush3.bf16.msra.mxu1 %v3664_v51 }
 0x563   :  { %4037 = vmatprep.subr.bf16.mxu1 %v4811_v4 }
 0x566   :  { %4039 = vmatpush3.bf16.msra.mxu1 %v3665_v52 }
 0x567   :  { %4040 = vmatprep.subr.bf16.mxu1 %v4811_v4 }
 0x56a   :  { %4042 = vmatpush3.bf16.msra.mxu1 %v3666_v53 }
 0x56b   :  { %4043 = vmatprep.subr.bf16.mxu1 %v4811_v4 }
 0x56e   :  { %4045 = vmatpush3.bf16.msra.mxu1 %v3667_v54 }
 0x624   :  { %v3037_v55 = vpop.f32.mrb[8].mxu1 }
 0x625   :  { %v3112_v56 = vmul.f32 %v3037_v55, %v3037_v55  ;;  %v3775_v57 = vpop.f32.mrb[9].mxu1  ;;  %v3115_v63 = vsub.f32 %v2969_v26, %v3037_v55 }
 0x626   :  { %v3108_v58 = vpop.f32.mrb[12].mxu0 }
 0x627   :  { %v3113_v59 = vsub.f32 %v3108_v58, %v3112_v56  ;;  %v3810_v60 = vpop.f32.mrb[13].mxu0 }
 0x629   :  { %v3114_v61 = vmax.f32 %v3113_v59, 0.0 }
 0x62b   :  { %v3116_v62 = vadd.f32 1e-06, %v3114_v61 }
 0x62d   :  { %4705 = vrsqrt.f32 %v3116_v62 }
 0x637   :  { %v4706_v0 = vpop.eup %4705 }
 0x638   :  { %v3118_v1 = vmul.f32 %v4706_v0, %v3115_v63 }
 0x63a   :  { %v3119_v2 = vmul.f32 0.2, %v3118_v1 }
 0x63c   :  { %v3120_v3 = vmax.f32 %v3118_v1, %v3119_v2 }
 0x63e   :  { %3121 = vst [vmem:[%s5314_s14] sm:$0xff] %v3120_v3  ;;  %3844 = vmatmul.mubr.f32.vlgmr.msra.gmra.mrb[10].mxu1 %v3120_v3 }
 0x711   :  { %v3220_v4 = vpop.f32.mrb[10].mxu1 }
 0x712   :  { %3225 = vst.msk [vmem:[%s5315_s15] sm:$0xff] %vm3224_vm1, %v3220_v4  ;;  %v3845_v5 = vpop.f32.mrb[11].mxu1 }
 0x713   :  { %3250 = vsyncpa [#allocation3], 1 }
 0x714   :  { %3251 = vsyncpa [#allocation5], 1 }
 0x715   :  { %3252 = vsyncpa [#allocation8], 1 }

</bundles_post_ra>
